<compile_context>
chip_gen: v6e
topology: v6e:2x2x1
jax: 0.10.0
libtpu: 0.0.40
codegen_flags: <defaults>
</compile_context>

<pallas_src>
import math
import functools

import jax
import jax.numpy as jnp
from jax.experimental import pallas as pl
from jax.experimental.pallas import tpu as pltpu


def _mha_kernel(q_ref, k_ref, v_ref, wq_ref, wk_ref, wv_ref, wo_ref, o_ref,
                *, h: int, d_k: int, tb: int, s: int):
    """One grid step processes `tb` independent (S, E) slabs of the (B*G) axis."""
    e = h * d_k
    rows = tb * s
    cdt = wq_ref.dtype          # compute dtype for MXU operands (bf16 by default)

    # ---- Q/K/V projections: one (tb*S, E) @ (E, E) MXU matmul each. ---------
    # Operands in the compute dtype, f32 accumulation only; results cast back
    # to the compute dtype right away (no long-lived f32 copies).
    # 1/sqrt(d_k) is already folded into wq in the wrapper.
    q2 = q_ref[...].reshape(rows, e).astype(cdt)
    k2 = k_ref[...].reshape(rows, e).astype(cdt)
    v2 = v_ref[...].reshape(rows, e).astype(cdt)

    qp = jnp.dot(q2, wq_ref[...], preferred_element_type=jnp.float32
                 ).reshape(tb, s, e).astype(cdt)
    kp = jnp.dot(k2, wk_ref[...], preferred_element_type=jnp.float32
                 ).reshape(tb, s, e).astype(cdt)
    vp = jnp.dot(v2, wv_ref[...], preferred_element_type=jnp.float32
                 ).reshape(tb, s, e).astype(cdt)

    # ---- Per-head attention + fused output projection. ----------------------
    # acc stays full lane width (rows, E) f32; per-head results are folded in
    # via ctx_h @ W_o[lo:lo+d_k, :] so no lane-masked partial store ever happens.
    acc = jnp.zeros((rows, e), jnp.float32)
    for head in range(h):                      # h is small; static slices
        lo = head * d_k
        qh = qp[:, :, lo:lo + d_k]             # (tb, S, d_k)
        kh = kp[:, :, lo:lo + d_k]
        vh = vp[:, :, lo:lo + d_k]

        # Q @ K^T without a materialized transpose: contract last axes.
        sc = jnp.einsum('bqd,bkd->bqk', qh, kh,
                        preferred_element_type=jnp.float32)   # (tb, S, S) f32
        # numerically-stable softmax over the last dim (f32 math).
        sc = sc - jnp.max(sc, axis=-1, keepdims=True)
        p = jnp.exp(sc)
        denom = jnp.sum(p, axis=-1, keepdims=True)
        p = (p * pl.reciprocal(denom, approx=True)).astype(cdt)   # EUP, not VALU div

        ctx_h = jnp.einsum('bqk,bkd->bqd', p, vh,
                           preferred_element_type=jnp.float32)    # (tb, S, d_k)
        ctx_h = ctx_h.reshape(rows, d_k).astype(cdt)

        # Accumulate this head's contribution to the output projection.
        acc = acc + jnp.dot(ctx_h, wo_ref[lo:lo + d_k, :],
                            preferred_element_type=jnp.float32)   # (rows, E) f32

    # ---- Single lane-dense output store. ------------------------------------
    o_ref[...] = acc.reshape(tb, s, e).astype(o_ref.dtype)


def _choose_block_bg(bg: int, s: int, e: int, h: int,
                     in_itemsize: int, out_itemsize: int, c_itemsize: int,
                     budget_bytes: int) -> int:
    """Largest divisor of BG (capped at BG//2 for >=2 grid steps) whose summed
    per-step VMEM footprint fits the budget."""
    def footprint(tb: int) -> int:
        rows = tb * s
        io = 2 * rows * e * (3 * in_itemsize + out_itemsize)   # dbl-buffered in/out slabs
        w = 4 * e * e * c_itemsize                             # weights (single-buffered)
        proj = 3 * rows * e * (4 + c_itemsize)                 # f32 matmul results + casts
        sm = 2 * rows * s * 4                                  # f32 scores + probs (1 head live)
        acc = rows * e * 4                                     # f32 output accumulator
        return io + w + proj + sm + acc

    cap = max(1, bg // 2) if bg >= 2 else 1   # keep >=2 grid steps (v7x has 2 TCs)
    best = 1
    for tb in range(1, cap + 1):
        if bg % tb == 0 and footprint(tb) <= budget_bytes:
            best = tb
    return best


def multi_head_attention(q, k, v, wq, wk, wv, wo, *, h: int,
                         block_bg=None, compute_dtype=jnp.bfloat16):
    """q, k, v: (B, G, S, E).  wq/wk/wv/wo: (E, E) in nn.Linear (out, in) layout."""
    assert q.shape == k.shape == v.shape, "self-attention-style shapes expected"
    B, G, S, E = q.shape
    assert E % h == 0
    d_k = E // h
    BG = B * G

    qf = q.reshape(BG, S, E)
    kf = k.reshape(BG, S, E)
    vf = v.reshape(BG, S, E)

    cdt = jnp.dtype(compute_dtype)
    scale = 1.0 / math.sqrt(d_k)
    # Pre-transpose nn.Linear weights (out,in) -> (in,out), fold the softmax
    # scale into W_q, and cast once to the MXU compute dtype.
    wq_t = (wq.T * scale).astype(cdt)
    wk_t = wk.T.astype(cdt)
    wv_t = wv.T.astype(cdt)
    wo_t = wo.T.astype(cdt)

    # ---- VMEM budget (generation-aware) & block size. ------------------------
    try:
        vmem_cap = int(pltpu.get_tpu_info().vmem_capacity_bytes)
    except Exception:
        vmem_cap = 64 << 20            # conservative: v7x per-TensorCore VMEM
    vmem_limit = (vmem_cap * 3) // 4   # leave headroom for compiler temps

    in_is = jnp.dtype(q.dtype).itemsize
    tb = (block_bg if block_bg is not None else
          _choose_block_bg(BG, S, E, h, in_is, in_is, cdt.itemsize,
                           vmem_limit // 2))
    assert BG % tb == 0
    grid = (BG // tb,)

    kernel = functools.partial(_mha_kernel, h=h, d_k=d_k, tb=tb, s=S)

    # Advisory cost hint so XLA schedules surrounding ops around the call.
    flops = int(BG * (8 * S * E * E + 4 * S * S * E))
    transcendentals = int(BG * h * S * S)
    bytes_accessed = int(4 * BG * S * E * in_is + 4 * E * E * cdt.itemsize)
    cost = pl.CostEstimate(flops=flops, transcendentals=transcendentals,
                           bytes_accessed=bytes_accessed)

    def _call(single_buffer_weights: bool):
        slab_spec = pl.BlockSpec((tb, S, E), lambda i: (i, 0, 0))
        if single_buffer_weights:
            # Constant index_map -> weights never change across grid steps; no
            # need for a second pipeline buffer.
            w_spec = pl.BlockSpec((E, E), lambda i: (0, 0),
                                  pipeline_mode=pl.Buffered(1))
        else:
            w_spec = pl.BlockSpec((E, E), lambda i: (0, 0))
        return pl.pallas_call(
            kernel,
            out_shape=jax.ShapeDtypeStruct((BG, S, E), q.dtype),
            grid_spec=pltpu.PrefetchScalarGridSpec(
                num_scalar_prefetch=0,
                grid=grid,
                in_specs=[slab_spec, slab_spec, slab_spec,
                          w_spec, w_spec, w_spec, w_spec],
                out_specs=slab_spec,
            ),
            compiler_params=pltpu.CompilerParams(
                dimension_semantics=("parallel",),
                vmem_limit_bytes=int(vmem_limit)),
            cost_estimate=cost,
        )(qf, kf, vf, wq_t, wk_t, wv_t, wo_t)

    try:
        out_flat = _call(hasattr(pl, "Buffered"))
    except Exception:
        # Fallback if this jax version rejects single-buffered weight specs.
        out_flat = _call(False)

    return out_flat.reshape(B, G, S, E)


def _reference(q, k, v, wq, wk, wv, wo, *, h: int):
    """Pure-JAX replica of the PyTorch forward (mask=None, eval dropout)."""
    B, G, S, E = q.shape
    d_k = E // h
    Q = jnp.einsum('bgse,oe->bgso', q, wq)
    K = jnp.einsum('bgse,oe->bgso', k, wk)
    V = jnp.einsum('bgse,oe->bgso', v, wv)
    Qh = Q.reshape(B, G, S, h, d_k).transpose(0, 1, 3, 2, 4)   # (B,G,h,S,d_k)
    Kh = K.reshape(B, G, S, h, d_k).transpose(0, 1, 3, 2, 4)
    Vh = V.reshape(B, G, S, h, d_k).transpose(0, 1, 3, 2, 4)
    s = jnp.einsum('bghqd,bghkd->bghqk', Qh, Kh) / math.sqrt(d_k)
    p = jax.nn.softmax(s, axis=-1)
    x = jnp.einsum('bghqk,bghkd->bghqd', p, Vh)
    x = x.transpose(0, 1, 3, 2, 4).reshape(B, G, S, E)
    return jnp.einsum('bgse,oe->bgso', x, wo)


if __name__ == "__main__":
    B, G, S = 2, 2, 8
    embed_dim, h = 32, 4

    key = jax.random.PRNGKey(0)
    kq, kk, kv, k1, k2, k3, k4 = jax.random.split(key, 7)

    q = jax.random.normal(kq, (B, G, S, embed_dim), dtype=jnp.float32)
    k = jax.random.normal(kk, (B, G, S, embed_dim), dtype=jnp.float32)
    v = jax.random.normal(kv, (B, G, S, embed_dim), dtype=jnp.float32)

    # Deterministic parameter init, nn.Linear layout (out_features, in_features).
    bound = 1.0 / math.sqrt(embed_dim)
    wq = jax.random.uniform(k1, (embed_dim, embed_dim), jnp.float32, -bound, bound)
    wk = jax.random.uniform(k2, (embed_dim, embed_dim), jnp.float32, -bound, bound)
    wv = jax.random.uniform(k3, (embed_dim, embed_dim), jnp.float32, -bound, bound)
    wo = jax.random.uniform(k4, (embed_dim, embed_dim), jnp.float32, -bound, bound)

    ref = _reference(q, k, v, wq, wk, wv, wo, h=h)

    # f32 compute path: only error source is the approx (EUP) softmax reciprocal.
    out_f32 = multi_head_attention(q, k, v, wq, wk, wv, wo, h=h,
                                   compute_dtype=jnp.float32)
    out_f32 = jax.block_until_ready(out_f32)
    assert out_f32.shape == (B, G, S, embed_dim)
    assert jnp.allclose(out_f32, ref, atol=2e-3, rtol=2e-3), "f32 path mismatch"

    # Default bf16 MXU-operand path (f32 accumulation). Tolerance reflects
    # bf16 operand precision (~2^-8 relative) chained through four matmuls.
    out_bf16 = multi_head_attention(q, k, v, wq, wk, wv, wo, h=h)
    out_bf16 = jax.block_until_ready(out_bf16)
    assert out_bf16.shape == (B, G, S, embed_dim)
    assert jnp.allclose(out_bf16, ref, atol=5e-2, rtol=5e-2), "bf16 path mismatch"

    print("KERNEL_OK")
</pallas_src>

<mosaic_0001>
module attributes {stable_mosaic.version = 11 : i64} {
  func.func @_mha_kernel(%arg0: i32, %arg1: memref<2x8x32xf32, #tpu.memory_space<vmem>>, %arg2: memref<2x8x32xf32, #tpu.memory_space<vmem>>, %arg3: memref<2x8x32xf32, #tpu.memory_space<vmem>>, %arg4: memref<32x32xf32, #tpu.memory_space<vmem>>, %arg5: memref<32x32xf32, #tpu.memory_space<vmem>>, %arg6: memref<32x32xf32, #tpu.memory_space<vmem>>, %arg7: memref<32x32xf32, #tpu.memory_space<vmem>>, %arg8: memref<2x8x32xf32, #tpu.memory_space<vmem>>) attributes {dimension_semantics = [#tpu.dimension_semantics<parallel>], iteration_bounds = array<i64: 2>, scalar_prefetch = 0 : i64, scratch_operands = 0 : i64, tpu.core_type = #tpu.core_type<tc>, window_params = [{transform_indices = @transform_0, window_bounds = array<i64: 2, 8, 32>}, {transform_indices = @transform_1, window_bounds = array<i64: 2, 8, 32>}, {transform_indices = @transform_2, window_bounds = array<i64: 2, 8, 32>}, {pipeline_mode = #tpu.pipeline_mode<synchronous>, transform_indices = @transform_3, window_bounds = array<i64: 32, 32>}, {pipeline_mode = #tpu.pipeline_mode<synchronous>, transform_indices = @transform_4, window_bounds = array<i64: 32, 32>}, {pipeline_mode = #tpu.pipeline_mode<synchronous>, transform_indices = @transform_5, window_bounds = array<i64: 32, 32>}, {pipeline_mode = #tpu.pipeline_mode<synchronous>, transform_indices = @transform_6, window_bounds = array<i64: 32, 32>}, {transform_indices = @transform_7, window_bounds = array<i64: 2, 8, 32>}]} {
    %c0 = arith.constant 0 : index
    %c0_0 = arith.constant 0 : index
    %c0_1 = arith.constant 0 : index
    %0 = vector.load %arg1[%c0, %c0_0, %c0_1] : memref<2x8x32xf32, #tpu.memory_space<vmem>>, vector<2x8x32xf32>
    %1 = vector.shape_cast %0 : vector<2x8x32xf32> to vector<16x32xf32>
    %c0_2 = arith.constant 0 : index
    %c0_3 = arith.constant 0 : index
    %c0_4 = arith.constant 0 : index
    %2 = vector.load %arg2[%c0_2, %c0_3, %c0_4] : memref<2x8x32xf32, #tpu.memory_space<vmem>>, vector<2x8x32xf32>
    %3 = vector.shape_cast %2 : vector<2x8x32xf32> to vector<16x32xf32>
    %c0_5 = arith.constant 0 : index
    %c0_6 = arith.constant 0 : index
    %c0_7 = arith.constant 0 : index
    %4 = vector.load %arg3[%c0_5, %c0_6, %c0_7] : memref<2x8x32xf32, #tpu.memory_space<vmem>>, vector<2x8x32xf32>
    %5 = vector.shape_cast %4 : vector<2x8x32xf32> to vector<16x32xf32>
    %c0_8 = arith.constant 0 : index
    %c0_9 = arith.constant 0 : index
    %6 = vector.load %arg4[%c0_8, %c0_9] : memref<32x32xf32, #tpu.memory_space<vmem>>, vector<32x32xf32>
    %cst = arith.constant dense<0.000000e+00> : vector<16x32xf32>
    %7 = tpu.matmul %1, %6, %cst {dimension_numbers = #tpu.dot_dimension_numbers<[1], [0], [0], [1], [0, 0, 1, 1], [], []>} : vector<16x32xf32>, vector<32x32xf32>, vector<16x32xf32> -> vector<16x32xf32>
    %8 = vector.shape_cast %7 : vector<16x32xf32> to vector<2x8x32xf32>
    %c0_10 = arith.constant 0 : index
    %c0_11 = arith.constant 0 : index
    %9 = vector.load %arg5[%c0_10, %c0_11] : memref<32x32xf32, #tpu.memory_space<vmem>>, vector<32x32xf32>
    %cst_12 = arith.constant dense<0.000000e+00> : vector<16x32xf32>
    %10 = tpu.matmul %3, %9, %cst_12 {dimension_numbers = #tpu.dot_dimension_numbers<[1], [0], [0], [1], [0, 0, 1, 1], [], []>} : vector<16x32xf32>, vector<32x32xf32>, vector<16x32xf32> -> vector<16x32xf32>
    %11 = vector.shape_cast %10 : vector<16x32xf32> to vector<2x8x32xf32>
    %c0_13 = arith.constant 0 : index
    %c0_14 = arith.constant 0 : index
    %12 = vector.load %arg6[%c0_13, %c0_14] : memref<32x32xf32, #tpu.memory_space<vmem>>, vector<32x32xf32>
    %cst_15 = arith.constant dense<0.000000e+00> : vector<16x32xf32>
    %13 = tpu.matmul %5, %12, %cst_15 {dimension_numbers = #tpu.dot_dimension_numbers<[1], [0], [0], [1], [0, 0, 1, 1], [], []>} : vector<16x32xf32>, vector<32x32xf32>, vector<16x32xf32> -> vector<16x32xf32>
    %14 = vector.shape_cast %13 : vector<16x32xf32> to vector<2x8x32xf32>
    %cst_16 = arith.constant 0.000000e+00 : f32
    %15 = vector.broadcast %cst_16 : f32 to vector<16x32xf32>
    %16 = vector.extract_strided_slice %8 {offsets = [0, 0, 0], sizes = [2, 8, 8], strides = [1, 1, 1]} : vector<2x8x32xf32> to vector<2x8x8xf32>
    %17 = vector.extract_strided_slice %11 {offsets = [0, 0, 0], sizes = [2, 8, 8], strides = [1, 1, 1]} : vector<2x8x32xf32> to vector<2x8x8xf32>
    %18 = vector.extract_strided_slice %14 {offsets = [0, 0, 0], sizes = [2, 8, 8], strides = [1, 1, 1]} : vector<2x8x32xf32> to vector<2x8x8xf32>
    "tpu.trace_start"() <{level = 10 : i32, message = "bqd,bkd->bqk"}> : () -> ()
    %cst_17 = arith.constant dense<0.000000e+00> : vector<2x8x8xf32>
    %19 = tpu.matmul %16, %17, %cst_17 {dimension_numbers = #tpu.dot_dimension_numbers<[2], [2], [1], [1], [0, 0, 0, 1, 1, 1], [0], [0]>} : vector<2x8x8xf32>, vector<2x8x8xf32>, vector<2x8x8xf32> -> vector<2x8x8xf32>
    "tpu.trace_stop"() : () -> ()
    %cst_18 = arith.constant dense<0xFF800000> : vector<2x8xf32>
    %20 = vector.multi_reduction <maximumf>, %19, %cst_18 [2] : vector<2x8x8xf32> to vector<2x8xf32>
    %21 = vector.shape_cast %20 : vector<2x8xf32> to vector<2x8x1xf32>
    %22 = vector.broadcast %21 : vector<2x8x1xf32> to vector<2x8x8xf32>
    %23 = arith.subf %19, %22 : vector<2x8x8xf32>
    %24 = math.exp %23 : vector<2x8x8xf32>
    %cst_19 = arith.constant dense<0.000000e+00> : vector<2x8xf32>
    %25 = vector.multi_reduction <add>, %24, %cst_19 [2] : vector<2x8x8xf32> to vector<2x8xf32>
    %26 = vector.shape_cast %25 : vector<2x8xf32> to vector<2x8x1xf32>
    %27 = tpu.reciprocal %26 {approx = true} : vector<2x8x1xf32> -> vector<2x8x1xf32>
    %28 = vector.broadcast %27 : vector<2x8x1xf32> to vector<2x8x8xf32>
    %29 = arith.mulf %24, %28 : vector<2x8x8xf32>
    "tpu.trace_start"() <{level = 10 : i32, message = "bqk,bkd->bqd"}> : () -> ()
    %cst_20 = arith.constant dense<0.000000e+00> : vector<2x8x8xf32>
    %30 = tpu.matmul %29, %18, %cst_20 {dimension_numbers = #tpu.dot_dimension_numbers<[2], [1], [1], [2], [0, 0, 0, 1, 1, 2], [0], [0]>} : vector<2x8x8xf32>, vector<2x8x8xf32>, vector<2x8x8xf32> -> vector<2x8x8xf32>
    "tpu.trace_stop"() : () -> ()
    %31 = vector.shape_cast %30 : vector<2x8x8xf32> to vector<16x8xf32>
    %c0_21 = arith.constant 0 : index
    %c0_22 = arith.constant 0 : index
    %32 = vector.load %arg7[%c0_21, %c0_22] : memref<32x32xf32, #tpu.memory_space<vmem>>, vector<8x32xf32>
    %cst_23 = arith.constant dense<0.000000e+00> : vector<16x32xf32>
    %33 = tpu.matmul %31, %32, %cst_23 {dimension_numbers = #tpu.dot_dimension_numbers<[1], [0], [0], [1], [0, 0, 1, 1], [], []>} : vector<16x8xf32>, vector<8x32xf32>, vector<16x32xf32> -> vector<16x32xf32>
    %34 = arith.addf %15, %33 : vector<16x32xf32>
    %35 = vector.extract_strided_slice %8 {offsets = [0, 0, 8], sizes = [2, 8, 8], strides = [1, 1, 1]} : vector<2x8x32xf32> to vector<2x8x8xf32>
    %36 = vector.extract_strided_slice %11 {offsets = [0, 0, 8], sizes = [2, 8, 8], strides = [1, 1, 1]} : vector<2x8x32xf32> to vector<2x8x8xf32>
    %37 = vector.extract_strided_slice %14 {offsets = [0, 0, 8], sizes = [2, 8, 8], strides = [1, 1, 1]} : vector<2x8x32xf32> to vector<2x8x8xf32>
    "tpu.trace_start"() <{level = 10 : i32, message = "bqd,bkd->bqk"}> : () -> ()
    %cst_24 = arith.constant dense<0.000000e+00> : vector<2x8x8xf32>
    %38 = tpu.matmul %35, %36, %cst_24 {dimension_numbers = #tpu.dot_dimension_numbers<[2], [2], [1], [1], [0, 0, 0, 1, 1, 1], [0], [0]>} : vector<2x8x8xf32>, vector<2x8x8xf32>, vector<2x8x8xf32> -> vector<2x8x8xf32>
    "tpu.trace_stop"() : () -> ()
    %cst_25 = arith.constant dense<0xFF800000> : vector<2x8xf32>
    %39 = vector.multi_reduction <maximumf>, %38, %cst_25 [2] : vector<2x8x8xf32> to vector<2x8xf32>
    %40 = vector.shape_cast %39 : vector<2x8xf32> to vector<2x8x1xf32>
    %41 = vector.broadcast %40 : vector<2x8x1xf32> to vector<2x8x8xf32>
    %42 = arith.subf %38, %41 : vector<2x8x8xf32>
    %43 = math.exp %42 : vector<2x8x8xf32>
    %cst_26 = arith.constant dense<0.000000e+00> : vector<2x8xf32>
    %44 = vector.multi_reduction <add>, %43, %cst_26 [2] : vector<2x8x8xf32> to vector<2x8xf32>
    %45 = vector.shape_cast %44 : vector<2x8xf32> to vector<2x8x1xf32>
    %46 = tpu.reciprocal %45 {approx = true} : vector<2x8x1xf32> -> vector<2x8x1xf32>
    %47 = vector.broadcast %46 : vector<2x8x1xf32> to vector<2x8x8xf32>
    %48 = arith.mulf %43, %47 : vector<2x8x8xf32>
    "tpu.trace_start"() <{level = 10 : i32, message = "bqk,bkd->bqd"}> : () -> ()
    %cst_27 = arith.constant dense<0.000000e+00> : vector<2x8x8xf32>
    %49 = tpu.matmul %48, %37, %cst_27 {dimension_numbers = #tpu.dot_dimension_numbers<[2], [1], [1], [2], [0, 0, 0, 1, 1, 2], [0], [0]>} : vector<2x8x8xf32>, vector<2x8x8xf32>, vector<2x8x8xf32> -> vector<2x8x8xf32>
    "tpu.trace_stop"() : () -> ()
    %50 = vector.shape_cast %49 : vector<2x8x8xf32> to vector<16x8xf32>
    %c8 = arith.constant 8 : index
    %c0_28 = arith.constant 0 : index
    %51 = vector.load %arg7[%c8, %c0_28] : memref<32x32xf32, #tpu.memory_space<vmem>>, vector<8x32xf32>
    %cst_29 = arith.constant dense<0.000000e+00> : vector<16x32xf32>
    %52 = tpu.matmul %50, %51, %cst_29 {dimension_numbers = #tpu.dot_dimension_numbers<[1], [0], [0], [1], [0, 0, 1, 1], [], []>} : vector<16x8xf32>, vector<8x32xf32>, vector<16x32xf32> -> vector<16x32xf32>
    %53 = arith.addf %34, %52 : vector<16x32xf32>
    %54 = vector.extract_strided_slice %8 {offsets = [0, 0, 16], sizes = [2, 8, 8], strides = [1, 1, 1]} : vector<2x8x32xf32> to vector<2x8x8xf32>
    %55 = vector.extract_strided_slice %11 {offsets = [0, 0, 16], sizes = [2, 8, 8], strides = [1, 1, 1]} : vector<2x8x32xf32> to vector<2x8x8xf32>
    %56 = vector.extract_strided_slice %14 {offsets = [0, 0, 16], sizes = [2, 8, 8], strides = [1, 1, 1]} : vector<2x8x32xf32> to vector<2x8x8xf32>
    "tpu.trace_start"() <{level = 10 : i32, message = "bqd,bkd->bqk"}> : () -> ()
    %cst_30 = arith.constant dense<0.000000e+00> : vector<2x8x8xf32>
    %57 = tpu.matmul %54, %55, %cst_30 {dimension_numbers = #tpu.dot_dimension_numbers<[2], [2], [1], [1], [0, 0, 0, 1, 1, 1], [0], [0]>} : vector<2x8x8xf32>, vector<2x8x8xf32>, vector<2x8x8xf32> -> vector<2x8x8xf32>
    "tpu.trace_stop"() : () -> ()
    %cst_31 = arith.constant dense<0xFF800000> : vector<2x8xf32>
    %58 = vector.multi_reduction <maximumf>, %57, %cst_31 [2] : vector<2x8x8xf32> to vector<2x8xf32>
    %59 = vector.shape_cast %58 : vector<2x8xf32> to vector<2x8x1xf32>
    %60 = vector.broadcast %59 : vector<2x8x1xf32> to vector<2x8x8xf32>
    %61 = arith.subf %57, %60 : vector<2x8x8xf32>
    %62 = math.exp %61 : vector<2x8x8xf32>
    %cst_32 = arith.constant dense<0.000000e+00> : vector<2x8xf32>
    %63 = vector.multi_reduction <add>, %62, %cst_32 [2] : vector<2x8x8xf32> to vector<2x8xf32>
    %64 = vector.shape_cast %63 : vector<2x8xf32> to vector<2x8x1xf32>
    %65 = tpu.reciprocal %64 {approx = true} : vector<2x8x1xf32> -> vector<2x8x1xf32>
    %66 = vector.broadcast %65 : vector<2x8x1xf32> to vector<2x8x8xf32>
    %67 = arith.mulf %62, %66 : vector<2x8x8xf32>
    "tpu.trace_start"() <{level = 10 : i32, message = "bqk,bkd->bqd"}> : () -> ()
    %cst_33 = arith.constant dense<0.000000e+00> : vector<2x8x8xf32>
    %68 = tpu.matmul %67, %56, %cst_33 {dimension_numbers = #tpu.dot_dimension_numbers<[2], [1], [1], [2], [0, 0, 0, 1, 1, 2], [0], [0]>} : vector<2x8x8xf32>, vector<2x8x8xf32>, vector<2x8x8xf32> -> vector<2x8x8xf32>
    "tpu.trace_stop"() : () -> ()
    %69 = vector.shape_cast %68 : vector<2x8x8xf32> to vector<16x8xf32>
    %c16 = arith.constant 16 : index
    %c0_34 = arith.constant 0 : index
    %70 = vector.load %arg7[%c16, %c0_34] : memref<32x32xf32, #tpu.memory_space<vmem>>, vector<8x32xf32>
    %cst_35 = arith.constant dense<0.000000e+00> : vector<16x32xf32>
    %71 = tpu.matmul %69, %70, %cst_35 {dimension_numbers = #tpu.dot_dimension_numbers<[1], [0], [0], [1], [0, 0, 1, 1], [], []>} : vector<16x8xf32>, vector<8x32xf32>, vector<16x32xf32> -> vector<16x32xf32>
    %72 = arith.addf %53, %71 : vector<16x32xf32>
    %73 = vector.extract_strided_slice %8 {offsets = [0, 0, 24], sizes = [2, 8, 8], strides = [1, 1, 1]} : vector<2x8x32xf32> to vector<2x8x8xf32>
    %74 = vector.extract_strided_slice %11 {offsets = [0, 0, 24], sizes = [2, 8, 8], strides = [1, 1, 1]} : vector<2x8x32xf32> to vector<2x8x8xf32>
    %75 = vector.extract_strided_slice %14 {offsets = [0, 0, 24], sizes = [2, 8, 8], strides = [1, 1, 1]} : vector<2x8x32xf32> to vector<2x8x8xf32>
    "tpu.trace_start"() <{level = 10 : i32, message = "bqd,bkd->bqk"}> : () -> ()
    %cst_36 = arith.constant dense<0.000000e+00> : vector<2x8x8xf32>
    %76 = tpu.matmul %73, %74, %cst_36 {dimension_numbers = #tpu.dot_dimension_numbers<[2], [2], [1], [1], [0, 0, 0, 1, 1, 1], [0], [0]>} : vector<2x8x8xf32>, vector<2x8x8xf32>, vector<2x8x8xf32> -> vector<2x8x8xf32>
    "tpu.trace_stop"() : () -> ()
    %cst_37 = arith.constant dense<0xFF800000> : vector<2x8xf32>
    %77 = vector.multi_reduction <maximumf>, %76, %cst_37 [2] : vector<2x8x8xf32> to vector<2x8xf32>
    %78 = vector.shape_cast %77 : vector<2x8xf32> to vector<2x8x1xf32>
    %79 = vector.broadcast %78 : vector<2x8x1xf32> to vector<2x8x8xf32>
    %80 = arith.subf %76, %79 : vector<2x8x8xf32>
    %81 = math.exp %80 : vector<2x8x8xf32>
    %cst_38 = arith.constant dense<0.000000e+00> : vector<2x8xf32>
    %82 = vector.multi_reduction <add>, %81, %cst_38 [2] : vector<2x8x8xf32> to vector<2x8xf32>
    %83 = vector.shape_cast %82 : vector<2x8xf32> to vector<2x8x1xf32>
    %84 = tpu.reciprocal %83 {approx = true} : vector<2x8x1xf32> -> vector<2x8x1xf32>
    %85 = vector.broadcast %84 : vector<2x8x1xf32> to vector<2x8x8xf32>
    %86 = arith.mulf %81, %85 : vector<2x8x8xf32>
    "tpu.trace_start"() <{level = 10 : i32, message = "bqk,bkd->bqd"}> : () -> ()
    %cst_39 = arith.constant dense<0.000000e+00> : vector<2x8x8xf32>
    %87 = tpu.matmul %86, %75, %cst_39 {dimension_numbers = #tpu.dot_dimension_numbers<[2], [1], [1], [2], [0, 0, 0, 1, 1, 2], [0], [0]>} : vector<2x8x8xf32>, vector<2x8x8xf32>, vector<2x8x8xf32> -> vector<2x8x8xf32>
    "tpu.trace_stop"() : () -> ()
    %88 = vector.shape_cast %87 : vector<2x8x8xf32> to vector<16x8xf32>
    %c24 = arith.constant 24 : index
    %c0_40 = arith.constant 0 : index
    %89 = vector.load %arg7[%c24, %c0_40] : memref<32x32xf32, #tpu.memory_space<vmem>>, vector<8x32xf32>
    %cst_41 = arith.constant dense<0.000000e+00> : vector<16x32xf32>
    %90 = tpu.matmul %88, %89, %cst_41 {dimension_numbers = #tpu.dot_dimension_numbers<[1], [0], [0], [1], [0, 0, 1, 1], [], []>} : vector<16x8xf32>, vector<8x32xf32>, vector<16x32xf32> -> vector<16x32xf32>
    %91 = arith.addf %72, %90 : vector<16x32xf32>
    %92 = vector.shape_cast %91 : vector<16x32xf32> to vector<2x8x32xf32>
    %c0_42 = arith.constant 0 : index
    %c0_43 = arith.constant 0 : index
    %c0_44 = arith.constant 0 : index
    %93 = vector.load %arg8[%c0_42, %c0_43, %c0_44] : memref<2x8x32xf32, #tpu.memory_space<vmem>>, vector<2x8x32xf32>
    tpu.vector_store %arg8[%c0_42, %c0_43, %c0_44], %92 {strides = array<i32>} : memref<2x8x32xf32, #tpu.memory_space<vmem>>, vector<2x8x32xf32>,
    return
  }
  func.func @transform_0(%arg0: i32) -> (i32, i32, i32) {
    %c0_i32 = arith.constant 0 : i32
    %c0_i32_0 = arith.constant 0 : i32
    %c0_i32_1 = arith.constant 0 : i32
    return %arg0, %c0_i32, %c0_i32_0 : i32, i32, i32
  }
  func.func @transform_1(%arg0: i32) -> (i32, i32, i32) {
    %c0_i32 = arith.constant 0 : i32
    %c0_i32_0 = arith.constant 0 : i32
    %c0_i32_1 = arith.constant 0 : i32
    return %arg0, %c0_i32, %c0_i32_0 : i32, i32, i32
  }
  func.func @transform_2(%arg0: i32) -> (i32, i32, i32) {
    %c0_i32 = arith.constant 0 : i32
    %c0_i32_0 = arith.constant 0 : i32
    %c0_i32_1 = arith.constant 0 : i32
    return %arg0, %c0_i32, %c0_i32_0 : i32, i32, i32
  }
  func.func @transform_3(%arg0: i32) -> (i32, i32) {
    %c0_i32 = arith.constant 0 : i32
    %c0_i32_0 = arith.constant 0 : i32
    %c0_i32_1 = arith.constant 0 : i32
    return %c0_i32, %c0_i32_0 : i32, i32
  }
  func.func @transform_4(%arg0: i32) -> (i32, i32) {
    %c0_i32 = arith.constant 0 : i32
    %c0_i32_0 = arith.constant 0 : i32
    %c0_i32_1 = arith.constant 0 : i32
    return %c0_i32, %c0_i32_0 : i32, i32
  }
  func.func @transform_5(%arg0: i32) -> (i32, i32) {
    %c0_i32 = arith.constant 0 : i32
    %c0_i32_0 = arith.constant 0 : i32
    %c0_i32_1 = arith.constant 0 : i32
    return %c0_i32, %c0_i32_0 : i32, i32
  }
  func.func @transform_6(%arg0: i32) -> (i32, i32) {
    %c0_i32 = arith.constant 0 : i32
    %c0_i32_0 = arith.constant 0 : i32
    %c0_i32_1 = arith.constant 0 : i32
    return %c0_i32, %c0_i32_0 : i32, i32
  }
  func.func @transform_7(%arg0: i32) -> (i32, i32, i32) {
    %c0_i32 = arith.constant 0 : i32
    %c0_i32_0 = arith.constant 0 : i32
    %c0_i32_1 = arith.constant 0 : i32
    return %arg0, %c0_i32, %c0_i32_0 : i32, i32, i32
  }
}

module attributes {stable_mosaic.version = 11 : i64} {
  func.func @_mha_kernel(%arg0: i32, %arg1: memref<2x8x32xf32, #tpu.memory_space<vmem>>, %arg2: memref<2x8x32xf32, #tpu.memory_space<vmem>>, %arg3: memref<2x8x32xf32, #tpu.memory_space<vmem>>, %arg4: memref<32x32xf32, #tpu.memory_space<vmem>>, %arg5: memref<32x32xf32, #tpu.memory_space<vmem>>, %arg6: memref<32x32xf32, #tpu.memory_space<vmem>>, %arg7: memref<32x32xf32, #tpu.memory_space<vmem>>, %arg8: memref<2x8x32xf32, #tpu.memory_space<vmem>>) attributes {dimension_semantics = [#tpu.dimension_semantics<parallel>], iteration_bounds = array<i64: 2>, scalar_prefetch = 0 : i64, scratch_operands = 0 : i64, tpu.core_type = #tpu.core_type<tc>, window_params = [{transform_indices = @transform_0, window_bounds = array<i64: 2, 8, 32>}, {transform_indices = @transform_1, window_bounds = array<i64: 2, 8, 32>}, {transform_indices = @transform_2, window_bounds = array<i64: 2, 8, 32>}, {pipeline_mode = #tpu.pipeline_mode<synchronous>, transform_indices = @transform_3, window_bounds = array<i64: 32, 32>}, {pipeline_mode = #tpu.pipeline_mode<synchronous>, transform_indices = @transform_4, window_bounds = array<i64: 32, 32>}, {pipeline_mode = #tpu.pipeline_mode<synchronous>, transform_indices = @transform_5, window_bounds = array<i64: 32, 32>}, {pipeline_mode = #tpu.pipeline_mode<synchronous>, transform_indices = @transform_6, window_bounds = array<i64: 32, 32>}, {transform_indices = @transform_7, window_bounds = array<i64: 2, 8, 32>}]} {
    %c0 = arith.constant 0 : index
    %c0_0 = arith.constant 0 : index
    %c0_1 = arith.constant 0 : index
    %0 = vector.load %arg1[%c0, %c0_0, %c0_1] : memref<2x8x32xf32, #tpu.memory_space<vmem>>, vector<2x8x32xf32>
    %1 = vector.shape_cast %0 : vector<2x8x32xf32> to vector<16x32xf32>
    %c0_2 = arith.constant 0 : index
    %c0_3 = arith.constant 0 : index
    %c0_4 = arith.constant 0 : index
    %2 = vector.load %arg2[%c0_2, %c0_3, %c0_4] : memref<2x8x32xf32, #tpu.memory_space<vmem>>, vector<2x8x32xf32>
    %3 = vector.shape_cast %2 : vector<2x8x32xf32> to vector<16x32xf32>
    %c0_5 = arith.constant 0 : index
    %c0_6 = arith.constant 0 : index
    %c0_7 = arith.constant 0 : index
    %4 = vector.load %arg3[%c0_5, %c0_6, %c0_7] : memref<2x8x32xf32, #tpu.memory_space<vmem>>, vector<2x8x32xf32>
    %5 = vector.shape_cast %4 : vector<2x8x32xf32> to vector<16x32xf32>
    %c0_8 = arith.constant 0 : index
    %c0_9 = arith.constant 0 : index
    %6 = vector.load %arg4[%c0_8, %c0_9] : memref<32x32xf32, #tpu.memory_space<vmem>>, vector<32x32xf32>
    %cst = arith.constant dense<0.000000e+00> : vector<16x32xf32>
    %7 = tpu.matmul %1, %6, %cst {dimension_numbers = #tpu.dot_dimension_numbers<[1], [0], [0], [1], [0, 0, 1, 1], [], []>} : vector<16x32xf32>, vector<32x32xf32>, vector<16x32xf32> -> vector<16x32xf32>
    %8 = vector.shape_cast %7 : vector<16x32xf32> to vector<2x8x32xf32>
    %c0_10 = arith.constant 0 : index
    %c0_11 = arith.constant 0 : index
    %9 = vector.load %arg5[%c0_10, %c0_11] : memref<32x32xf32, #tpu.memory_space<vmem>>, vector<32x32xf32>
    %cst_12 = arith.constant dense<0.000000e+00> : vector<16x32xf32>
    %10 = tpu.matmul %3, %9, %cst_12 {dimension_numbers = #tpu.dot_dimension_numbers<[1], [0], [0], [1], [0, 0, 1, 1], [], []>} : vector<16x32xf32>, vector<32x32xf32>, vector<16x32xf32> -> vector<16x32xf32>
    %11 = vector.shape_cast %10 : vector<16x32xf32> to vector<2x8x32xf32>
    %c0_13 = arith.constant 0 : index
    %c0_14 = arith.constant 0 : index
    %12 = vector.load %arg6[%c0_13, %c0_14] : memref<32x32xf32, #tpu.memory_space<vmem>>, vector<32x32xf32>
    %cst_15 = arith.constant dense<0.000000e+00> : vector<16x32xf32>
    %13 = tpu.matmul %5, %12, %cst_15 {dimension_numbers = #tpu.dot_dimension_numbers<[1], [0], [0], [1], [0, 0, 1, 1], [], []>} : vector<16x32xf32>, vector<32x32xf32>, vector<16x32xf32> -> vector<16x32xf32>
    %14 = vector.shape_cast %13 : vector<16x32xf32> to vector<2x8x32xf32>
    %cst_16 = arith.constant 0.000000e+00 : f32
    %15 = vector.broadcast %cst_16 : f32 to vector<16x32xf32>
    %16 = vector.extract_strided_slice %8 {offsets = [0, 0, 0], sizes = [2, 8, 8], strides = [1, 1, 1]} : vector<2x8x32xf32> to vector<2x8x8xf32>
    %17 = vector.extract_strided_slice %11 {offsets = [0, 0, 0], sizes = [2, 8, 8], strides = [1, 1, 1]} : vector<2x8x32xf32> to vector<2x8x8xf32>
    %18 = vector.extract_strided_slice %14 {offsets = [0, 0, 0], sizes = [2, 8, 8], strides = [1, 1, 1]} : vector<2x8x32xf32> to vector<2x8x8xf32>
    "tpu.trace_start"() <{level = 10 : i32, message = "bqd,bkd->bqk"}> : () -> ()
    %cst_17 = arith.constant dense<0.000000e+00> : vector<2x8x8xf32>
    %19 = tpu.matmul %16, %17, %cst_17 {dimension_numbers = #tpu.dot_dimension_numbers<[2], [2], [1], [1], [0, 0, 0, 1, 1, 1], [0], [0]>} : vector<2x8x8xf32>, vector<2x8x8xf32>, vector<2x8x8xf32> -> vector<2x8x8xf32>
    "tpu.trace_stop"() : () -> ()
    %cst_18 = arith.constant dense<0xFF800000> : vector<2x8xf32>
    %20 = vector.multi_reduction <maximumf>, %19, %cst_18 [2] : vector<2x8x8xf32> to vector<2x8xf32>
    %21 = vector.shape_cast %20 : vector<2x8xf32> to vector<2x8x1xf32>
    %22 = vector.broadcast %21 : vector<2x8x1xf32> to vector<2x8x8xf32>
    %23 = arith.subf %19, %22 : vector<2x8x8xf32>
    %24 = math.exp %23 : vector<2x8x8xf32>
    %cst_19 = arith.constant dense<0.000000e+00> : vector<2x8xf32>
    %25 = vector.multi_reduction <add>, %24, %cst_19 [2] : vector<2x8x8xf32> to vector<2x8xf32>
    %26 = vector.shape_cast %25 : vector<2x8xf32> to vector<2x8x1xf32>
    %27 = tpu.reciprocal %26 {approx = true} : vector<2x8x1xf32> -> vector<2x8x1xf32>
    %28 = vector.broadcast %27 : vector<2x8x1xf32> to vector<2x8x8xf32>
    %29 = arith.mulf %24, %28 : vector<2x8x8xf32>
    "tpu.trace_start"() <{level = 10 : i32, message = "bqk,bkd->bqd"}> : () -> ()
    %cst_20 = arith.constant dense<0.000000e+00> : vector<2x8x8xf32>
    %30 = tpu.matmul %29, %18, %cst_20 {dimension_numbers = #tpu.dot_dimension_numbers<[2], [1], [1], [2], [0, 0, 0, 1, 1, 2], [0], [0]>} : vector<2x8x8xf32>, vector<2x8x8xf32>, vector<2x8x8xf32> -> vector<2x8x8xf32>
    "tpu.trace_stop"() : () -> ()
    %31 = vector.shape_cast %30 : vector<2x8x8xf32> to vector<16x8xf32>
    %c0_21 = arith.constant 0 : index
    %c0_22 = arith.constant 0 : index
    %32 = vector.load %arg7[%c0_21, %c0_22] : memref<32x32xf32, #tpu.memory_space<vmem>>, vector<8x32xf32>
    %cst_23 = arith.constant dense<0.000000e+00> : vector<16x32xf32>
    %33 = tpu.matmul %31, %32, %cst_23 {dimension_numbers = #tpu.dot_dimension_numbers<[1], [0], [0], [1], [0, 0, 1, 1], [], []>} : vector<16x8xf32>, vector<8x32xf32>, vector<16x32xf32> -> vector<16x32xf32>
    %34 = arith.addf %15, %33 : vector<16x32xf32>
    %35 = vector.extract_strided_slice %8 {offsets = [0, 0, 8], sizes = [2, 8, 8], strides = [1, 1, 1]} : vector<2x8x32xf32> to vector<2x8x8xf32>
    %36 = vector.extract_strided_slice %11 {offsets = [0, 0, 8], sizes = [2, 8, 8], strides = [1, 1, 1]} : vector<2x8x32xf32> to vector<2x8x8xf32>
    %37 = vector.extract_strided_slice %14 {offsets = [0, 0, 8], sizes = [2, 8, 8], strides = [1, 1, 1]} : vector<2x8x32xf32> to vector<2x8x8xf32>
    "tpu.trace_start"() <{level = 10 : i32, message = "bqd,bkd->bqk"}> : () -> ()
    %cst_24 = arith.constant dense<0.000000e+00> : vector<2x8x8xf32>
    %38 = tpu.matmul %35, %36, %cst_24 {dimension_numbers = #tpu.dot_dimension_numbers<[2], [2], [1], [1], [0, 0, 0, 1, 1, 1], [0], [0]>} : vector<2x8x8xf32>, vector<2x8x8xf32>, vector<2x8x8xf32> -> vector<2x8x8xf32>
    "tpu.trace_stop"() : () -> ()
    %cst_25 = arith.constant dense<0xFF800000> : vector<2x8xf32>
    %39 = vector.multi_reduction <maximumf>, %38, %cst_25 [2] : vector<2x8x8xf32> to vector<2x8xf32>
    %40 = vector.shape_cast %39 : vector<2x8xf32> to vector<2x8x1xf32>
    %41 = vector.broadcast %40 : vector<2x8x1xf32> to vector<2x8x8xf32>
    %42 = arith.subf %38, %41 : vector<2x8x8xf32>
    %43 = math.exp %42 : vector<2x8x8xf32>
    %cst_26 = arith.constant dense<0.000000e+00> : vector<2x8xf32>
    %44 = vector.multi_reduction <add>, %43, %cst_26 [2] : vector<2x8x8xf32> to vector<2x8xf32>
    %45 = vector.shape_cast %44 : vector<2x8xf32> to vector<2x8x1xf32>
    %46 = tpu.reciprocal %45 {approx = true} : vector<2x8x1xf32> -> vector<2x8x1xf32>
    %47 = vector.broadcast %46 : vector<2x8x1xf32> to vector<2x8x8xf32>
    %48 = arith.mulf %43, %47 : vector<2x8x8xf32>
    "tpu.trace_start"() <{level = 10 : i32, message = "bqk,bkd->bqd"}> : () -> ()
    %cst_27 = arith.constant dense<0.000000e+00> : vector<2x8x8xf32>
    %49 = tpu.matmul %48, %37, %cst_27 {dimension_numbers = #tpu.dot_dimension_numbers<[2], [1], [1], [2], [0, 0, 0, 1, 1, 2], [0], [0]>} : vector<2x8x8xf32>, vector<2x8x8xf32>, vector<2x8x8xf32> -> vector<2x8x8xf32>
    "tpu.trace_stop"() : () -> ()
    %50 = vector.shape_cast %49 : vector<2x8x8xf32> to vector<16x8xf32>
    %c8 = arith.constant 8 : index
    %c0_28 = arith.constant 0 : index
    %51 = vector.load %arg7[%c8, %c0_28] : memref<32x32xf32, #tpu.memory_space<vmem>>, vector<8x32xf32>
    %cst_29 = arith.constant dense<0.000000e+00> : vector<16x32xf32>
    %52 = tpu.matmul %50, %51, %cst_29 {dimension_numbers = #tpu.dot_dimension_numbers<[1], [0], [0], [1], [0, 0, 1, 1], [], []>} : vector<16x8xf32>, vector<8x32xf32>, vector<16x32xf32> -> vector<16x32xf32>
    %53 = arith.addf %34, %52 : vector<16x32xf32>
    %54 = vector.extract_strided_slice %8 {offsets = [0, 0, 16], sizes = [2, 8, 8], strides = [1, 1, 1]} : vector<2x8x32xf32> to vector<2x8x8xf32>
    %55 = vector.extract_strided_slice %11 {offsets = [0, 0, 16], sizes = [2, 8, 8], strides = [1, 1, 1]} : vector<2x8x32xf32> to vector<2x8x8xf32>
    %56 = vector.extract_strided_slice %14 {offsets = [0, 0, 16], sizes = [2, 8, 8], strides = [1, 1, 1]} : vector<2x8x32xf32> to vector<2x8x8xf32>
    "tpu.trace_start"() <{level = 10 : i32, message = "bqd,bkd->bqk"}> : () -> ()
    %cst_30 = arith.constant dense<0.000000e+00> : vector<2x8x8xf32>
    %57 = tpu.matmul %54, %55, %cst_30 {dimension_numbers = #tpu.dot_dimension_numbers<[2], [2], [1], [1], [0, 0, 0, 1, 1, 1], [0], [0]>} : vector<2x8x8xf32>, vector<2x8x8xf32>, vector<2x8x8xf32> -> vector<2x8x8xf32>
    "tpu.trace_stop"() : () -> ()
    %cst_31 = arith.constant dense<0xFF800000> : vector<2x8xf32>
    %58 = vector.multi_reduction <maximumf>, %57, %cst_31 [2] : vector<2x8x8xf32> to vector<2x8xf32>
    %59 = vector.shape_cast %58 : vector<2x8xf32> to vector<2x8x1xf32>
    %60 = vector.broadcast %59 : vector<2x8x1xf32> to vector<2x8x8xf32>
    %61 = arith.subf %57, %60 : vector<2x8x8xf32>
    %62 = math.exp %61 : vector<2x8x8xf32>
    %cst_32 = arith.constant dense<0.000000e+00> : vector<2x8xf32>
    %63 = vector.multi_reduction <add>, %62, %cst_32 [2] : vector<2x8x8xf32> to vector<2x8xf32>
    %64 = vector.shape_cast %63 : vector<2x8xf32> to vector<2x8x1xf32>
    %65 = tpu.reciprocal %64 {approx = true} : vector<2x8x1xf32> -> vector<2x8x1xf32>
    %66 = vector.broadcast %65 : vector<2x8x1xf32> to vector<2x8x8xf32>
    %67 = arith.mulf %62, %66 : vector<2x8x8xf32>
    "tpu.trace_start"() <{level = 10 : i32, message = "bqk,bkd->bqd"}> : () -> ()
    %cst_33 = arith.constant dense<0.000000e+00> : vector<2x8x8xf32>
    %68 = tpu.matmul %67, %56, %cst_33 {dimension_numbers = #tpu.dot_dimension_numbers<[2], [1], [1], [2], [0, 0, 0, 1, 1, 2], [0], [0]>} : vector<2x8x8xf32>, vector<2x8x8xf32>, vector<2x8x8xf32> -> vector<2x8x8xf32>
    "tpu.trace_stop"() : () -> ()
    %69 = vector.shape_cast %68 : vector<2x8x8xf32> to vector<16x8xf32>
    %c16 = arith.constant 16 : index
    %c0_34 = arith.constant 0 : index
    %70 = vector.load %arg7[%c16, %c0_34] : memref<32x32xf32, #tpu.memory_space<vmem>>, vector<8x32xf32>
    %cst_35 = arith.constant dense<0.000000e+00> : vector<16x32xf32>
    %71 = tpu.matmul %69, %70, %cst_35 {dimension_numbers = #tpu.dot_dimension_numbers<[1], [0], [0], [1], [0, 0, 1, 1], [], []>} : vector<16x8xf32>, vector<8x32xf32>, vector<16x32xf32> -> vector<16x32xf32>
    %72 = arith.addf %53, %71 : vector<16x32xf32>
    %73 = vector.extract_strided_slice %8 {offsets = [0, 0, 24], sizes = [2, 8, 8], strides = [1, 1, 1]} : vector<2x8x32xf32> to vector<2x8x8xf32>
    %74 = vector.extract_strided_slice %11 {offsets = [0, 0, 24], sizes = [2, 8, 8], strides = [1, 1, 1]} : vector<2x8x32xf32> to vector<2x8x8xf32>
    %75 = vector.extract_strided_slice %14 {offsets = [0, 0, 24], sizes = [2, 8, 8], strides = [1, 1, 1]} : vector<2x8x32xf32> to vector<2x8x8xf32>
    "tpu.trace_start"() <{level = 10 : i32, message = "bqd,bkd->bqk"}> : () -> ()
    %cst_36 = arith.constant dense<0.000000e+00> : vector<2x8x8xf32>
    %76 = tpu.matmul %73, %74, %cst_36 {dimension_numbers = #tpu.dot_dimension_numbers<[2], [2], [1], [1], [0, 0, 0, 1, 1, 1], [0], [0]>} : vector<2x8x8xf32>, vector<2x8x8xf32>, vector<2x8x8xf32> -> vector<2x8x8xf32>
    "tpu.trace_stop"() : () -> ()
    %cst_37 = arith.constant dense<0xFF800000> : vector<2x8xf32>
    %77 = vector.multi_reduction <maximumf>, %76, %cst_37 [2] : vector<2x8x8xf32> to vector<2x8xf32>
    %78 = vector.shape_cast %77 : vector<2x8xf32> to vector<2x8x1xf32>
    %79 = vector.broadcast %78 : vector<2x8x1xf32> to vector<2x8x8xf32>
    %80 = arith.subf %76, %79 : vector<2x8x8xf32>
    %81 = math.exp %80 : vector<2x8x8xf32>
    %cst_38 = arith.constant dense<0.000000e+00> : vector<2x8xf32>
    %82 = vector.multi_reduction <add>, %81, %cst_38 [2] : vector<2x8x8xf32> to vector<2x8xf32>
    %83 = vector.shape_cast %82 : vector<2x8xf32> to vector<2x8x1xf32>
    %84 = tpu.reciprocal %83 {approx = true} : vector<2x8x1xf32> -> vector<2x8x1xf32>
    %85 = vector.broadcast %84 : vector<2x8x1xf32> to vector<2x8x8xf32>
    %86 = arith.mulf %81, %85 : vector<2x8x8xf32>
    "tpu.trace_start"() <{level = 10 : i32, message = "bqk,bkd->bqd"}> : () -> ()
    %cst_39 = arith.constant dense<0.000000e+00> : vector<2x8x8xf32>
    %87 = tpu.matmul %86, %75, %cst_39 {dimension_numbers = #tpu.dot_dimension_numbers<[2], [1], [1], [2], [0, 0, 0, 1, 1, 2], [0], [0]>} : vector<2x8x8xf32>, vector<2x8x8xf32>, vector<2x8x8xf32> -> vector<2x8x8xf32>
    "tpu.trace_stop"() : () -> ()
    %88 = vector.shape_cast %87 : vector<2x8x8xf32> to vector<16x8xf32>
    %c24 = arith.constant 24 : index
    %c0_40 = arith.constant 0 : index
    %89 = vector.load %arg7[%c24, %c0_40] : memref<32x32xf32, #tpu.memory_space<vmem>>, vector<8x32xf32>
    %cst_41 = arith.constant dense<0.000000e+00> : vector<16x32xf32>
    %90 = tpu.matmul %88, %89, %cst_41 {dimension_numbers = #tpu.dot_dimension_numbers<[1], [0], [0], [1], [0, 0, 1, 1], [], []>} : vector<16x8xf32>, vector<8x32xf32>, vector<16x32xf32> -> vector<16x32xf32>
    %91 = arith.addf %72, %90 : vector<16x32xf32>
    %92 = vector.shape_cast %91 : vector<16x32xf32> to vector<2x8x32xf32>
    %c0_42 = arith.constant 0 : index
    %c0_43 = arith.constant 0 : index
    %c0_44 = arith.constant 0 : index
    %93 = vector.load %arg8[%c0_42, %c0_43, %c0_44] : memref<2x8x32xf32, #tpu.memory_space<vmem>>, vector<2x8x32xf32>
    tpu.vector_store %arg8[%c0_42, %c0_43, %c0_44], %92 {strides = array<i32>} : memref<2x8x32xf32, #tpu.memory_space<vmem>>, vector<2x8x32xf32>,
    return
  }
  func.func @transform_0(%arg0: i32) -> (i32, i32, i32) {
    %c0_i32 = arith.constant 0 : i32
    %c0_i32_0 = arith.constant 0 : i32
    %c0_i32_1 = arith.constant 0 : i32
    return %arg0, %c0_i32, %c0_i32_0 : i32, i32, i32
  }
  func.func @transform_1(%arg0: i32) -> (i32, i32, i32) {
    %c0_i32 = arith.constant 0 : i32
    %c0_i32_0 = arith.constant 0 : i32
    %c0_i32_1 = arith.constant 0 : i32
    return %arg0, %c0_i32, %c0_i32_0 : i32, i32, i32
  }
  func.func @transform_2(%arg0: i32) -> (i32, i32, i32) {
    %c0_i32 = arith.constant 0 : i32
    %c0_i32_0 = arith.constant 0 : i32
    %c0_i32_1 = arith.constant 0 : i32
    return %arg0, %c0_i32, %c0_i32_0 : i32, i32, i32
  }
  func.func @transform_3(%arg0: i32) -> (i32, i32) {
    %c0_i32 = arith.constant 0 : i32
    %c0_i32_0 = arith.constant 0 : i32
    %c0_i32_1 = arith.constant 0 : i32
    return %c0_i32, %c0_i32_0 : i32, i32
  }
  func.func @transform_4(%arg0: i32) -> (i32, i32) {
    %c0_i32 = arith.constant 0 : i32
    %c0_i32_0 = arith.constant 0 : i32
    %c0_i32_1 = arith.constant 0 : i32
    return %c0_i32, %c0_i32_0 : i32, i32
  }
  func.func @transform_5(%arg0: i32) -> (i32, i32) {
    %c0_i32 = arith.constant 0 : i32
    %c0_i32_0 = arith.constant 0 : i32
    %c0_i32_1 = arith.constant 0 : i32
    return %c0_i32, %c0_i32_0 : i32, i32
  }
  func.func @transform_6(%arg0: i32) -> (i32, i32) {
    %c0_i32 = arith.constant 0 : i32
    %c0_i32_0 = arith.constant 0 : i32
    %c0_i32_1 = arith.constant 0 : i32
    return %c0_i32, %c0_i32_0 : i32, i32
  }
  func.func @transform_7(%arg0: i32) -> (i32, i32, i32) {
    %c0_i32 = arith.constant 0 : i32
    %c0_i32_0 = arith.constant 0 : i32
    %c0_i32_1 = arith.constant 0 : i32
    return %arg0, %c0_i32, %c0_i32_0 : i32, i32, i32
  }
}

</mosaic_0001>

<bundles_post_ra>
// kernel: tpu_custom_call.1
= control target key start
LH: loop header
LB: loop body
LE: loop exit
PB: predicated region body
PF: predicated region fallthrough
CT: control target
= control target key end

     0   :  { %s3734_s0 = inlined_call_operand.hbm [shape: f32[4,8,32], index: 0, kind: input, shape index: {}]   ;;  %s3735_s1 = inlined_call_operand.hbm [shape: f32[4,8,32], index: 1, kind: input, shape index: {}]   ;;  %s3736_s2 = inlined_call_operand.hbm [shape: f32[4,8,32], index: 2, kind: input, shape index: {}]   ;;  %s3737_s3 = inlined_call_operand.hbm [shape: f32[32,32], index: 3, kind: input, shape index: {}]   ;;  %s3738_s4 = inlined_call_operand.hbm [shape: f32[32,32], index: 4, kind: input, shape index: {}]   ;;  %s3739_s5 = inlined_call_operand.hbm [shape: f32[32,32], index: 5, kind: input, shape index: {}]   ;;  %s3740_s6 = inlined_call_operand.hbm [shape: f32[32,32], index: 6, kind: input, shape index: {}]   ;;  %s3741_s7 = inlined_call_operand.hbm [shape: f32[4,8,32], index: 7, kind: output, shape index: {}]  }
   0x1   :  { %3757 = sst [smem:[#allocation23_spill]] %s3735_s1 }
   0x2   :  { %3758 = sst [smem:[#allocation24_spill]] %s3737_s3 }
   0x3   :  { %3759 = sst [smem:[#allocation25_spill]] %s3739_s5 }
   0x4   :  { %12 = vsyncpa [#allocation3], 0 }
   0x5   :  { %14 = vsyncpa [#allocation3 + $0x1], 0 }
   0x6   :  { %15 = vsyncpa [#allocation6], 0 }
   0x7   :  { %17 = vsyncpa [#allocation6 + $0x1], 0 }
   0x8   :  { %18 = vsyncpa [#allocation9], 0 }
   0x9   :  { %19 = vsyncpa [#allocation12], 0 }
   0xa   :  { %20 = vsyncpa [#allocation4], 0 }
   0xb   :  { %22 = vsyncpa [#allocation4 + $0x1], 0  ;;  %s3241_s24 = smov 0   ;;  %s3243_s25 = smov 0  }
   0xc   :  { %s3245_s26 = smov 0   ;;  %s3247_s27 = smov 0  }
   0xd LB: > { %3760 = sst [smem:[#allocation20_spill]] %s3182_s27  ;;  %s3262_s28 = sadd.s32 4294967295, %s3182_s27   ;;  %s3182_s27 = sphi %s3247_s27, %s3789_s27   ;;  %s3178_s26 = sphi %s3245_s26, %s3793_s26   ;;  %s3174_s25 = sphi %s3243_s25, %s3792_s25   ;;  %s3170_s24 = sphi %s3241_s24, %s3791_s24  }
   0xe   : > { %s2513_s29 = sadd.s32 4294967294, %s3182_s27   ;;  %p48_p0 = scmp.ne.s32.totalorder %s3174_s25, %s3170_s24 }
   0xf   : > { %p3749_p1 = scmp.eq.s32.totalorder %s3262_s28, 0  ;;  %p208_p2 = scmp.eq.s32.totalorder %s3262_s28, 1 }
  0x10   : > { %p214_p3 = scmp.eq.s32.totalorder %s2513_s29, 1  ;;  %p2514_p5 = scmp.ge.s32.totalorder %s3182_s27, 1 }
  0x11   : > { %p3271_p4 = por %p3749_p1, %p48_p0  ;;  %p221_p7 = scmp.lt.s32.totalorder %s3182_s27, 3 }
  0x12   : > { %p3276_p6 = por %p214_p3, %p48_p0  ;;  %s3184_s10 = smov [#allocation8]  }
  0x13   : > { %s3761_s30 = scalar_select %p3271_p4, 1, 0 }
  0x14   : > { %s3762_s8 = scalar_select %p3276_p6, 1, 0 }
  0x15   : > { %p3281_p8 = pnand %p2514_p5, %p221_p7  ;;  %s233_s11 = sshll.u32 %s3184_s10, 4  ;;  %s234_s11 = int_to_ptr.vmem [resolvable:$true] %s233_s11 }
  0x16   : > { %s3185_s13 = smov [#allocation11]   ;;  %s2929_s15 = scalar_lea.vmem %s234_s11, 512 }
  0x17   : > { %s3763_s9 = scalar_select %p3281_p8, 1, 0 }
  0x18   : > { %p2804_p9 = pneg %p3281_p8  ;;  %s259_s14 = sshll.u32 %s3185_s13, 4  ;;  %s260_s14 = int_to_ptr.vmem [resolvable:$true] %s259_s14 }
  0x19   : > { %p2930_p13 = scmp.ne.s32.totalorder %s234_s11, %s2929_s15  ;;  %p2937_p5 = scmp.lt.s32.totalorder %s234_s11, %s234_s11 }
  0x1a   : > { %p3290_p11 = pnand %p2804_p9, %p3749_p1  ;;  %p2938_p7 = scmp.lt.s32.totalorder %s2929_s15, %s2929_s15 }
  0x1c   : > { %s3764_s12 = scalar_select %p3290_p11, 1, 0 }
  0x1d   : > { %p3750_p12 = pneg %p3290_p11  ;;  %p2939_p10 = por %p2938_p7, %p2937_p5 }
  0x1f   : > { %p2932_p0 = pnand %p2930_p13, %p3750_p12 }
  0x21   : > { %p2933_p3 = pneg %p2932_p0 }
  0x23   : > { %p2940_p9 = pnand %p2939_p10, %p2933_p3 }
  0x25   : > { %2943 = shalt.err (!%p2940_p9)
}
  0x26   : > { %s3743_s16 = smov 128   ;;  %s3745_s17 = smov 8  }
  0x27   : > { %s3765_s3 = sld [smem:[#allocation24_spill]]  ;;  %s2955_s20 = scalar_lea.vmem %s260_s14, 512 }
  0x28   : > { %p2956_p13 = scmp.ne.s32.totalorder %s260_s14, %s2955_s20  ;;  %p2963_p10 = scmp.lt.s32.totalorder %s260_s14, %s260_s14 }
  0x29   : > { %p2964_p3 = scmp.lt.s32.totalorder %s2955_s20, %s2955_s20 }
  0x2a   : > { %p2958_p0 = pnand %p2956_p13, %p3750_p12 }
  0x2b   : > { %p2965_p7 = por %p2964_p3, %p2963_p10 }
  0x2c   : > { %p2959_p5 = pneg %p2958_p0 }
  0x2d   : > { %2807 = dma.hbm_to_vmem [thread:$0]  (!%p3290_p11), %s3765_s3, 512, %s234_s11, [#allocation9], %s3743_s16, %s3743_s16, %s3745_s17  }
  0x2e   : > { %p2966_p9 = pnand %p2965_p7, %p2959_p5 }
  0x30   : > { %2969 = shalt.err (!%p2966_p9)
}
  0x31   : > { %s3766_s5 = sld [smem:[#allocation25_spill]]  ;;  %s3319_s23 = sadd.s32 1, %s3182_s27  }
  0x32   : > { %3767 = sst [smem:[#allocation21_spill]] %s3319_s23  ;;  %s35_s29 = sadd.s32 1, %s3178_s26 }
  0x33   : > { %s32_s10 = ssub.s32 %s3182_s27, %s3319_s23  ;;  %p42_p13 = scmp.ne.s32.totalorder %s3178_s26, %s3174_s25 }
  0x34   : > { %p33_p0 = scmp.eq.s32.totalorder %s32_s10, 0  ;;  %p43_p5 = scmp.eq.s32.totalorder %s3182_s27, 0 }
  0x35   : > { %p3329_p10 = por %p208_p2, %p42_p13  ;;  %p2835_p3 = scmp.lt.s32.totalorder %s3182_s27, 2 }
  0x36   : > { %s3335_s13 = scalar_select %p33_p0, %s3178_s26, %s35_s29  }
  0x37   : > { %2813 = dma.hbm_to_vmem [thread:$0]  (!%p3290_p11), %s3766_s5, 512, %s260_s14, [#allocation12], %s3743_s16, %s3743_s16, %s3745_s17  }
  0x38   : > { %s3768_s11 = scalar_select %p3329_p10, 1, 0 }
  0x39   : > { %3769 = sst [smem:[#allocation22_spill]] %s3335_s13  ;;  %p44_p7 = por %p43_p5, %p42_p13 }
  0x3a   : > { %s3742_s15 = sand.u32 1, %s3178_s26   ;;  %s3343_s18 = sshll.u32 %s3182_s27, 8 }
  0x3b   : > { %s3340_s14 = sshll.u32 %s3742_s15, 4  ;;  %p3345_p9 = pnand %p2835_p3, %p44_p7 }
  0x3c   : > { %s307_s20 = sand.u32 1, %s3182_s27   ;;  %s3771_s1 = sld [smem:[#allocation23_spill]] }
  0x3d   : > { %s311_s10 = scalar_lea.vmem [#allocation5], %s3340_s14  ;;  %s3188_s16 = smov [#allocation10]  }
  0x3e   : > { %s318_s15 = sshll.u32 %s311_s10, 4  ;;  %s3359_s17 = sshll.u32 %s3188_s16, 4  ;;  %s3357_s15 = int_to_ptr.vmem [resolvable:$true] %s318_s15  ;;  %s247_s17 = int_to_ptr.vmem [resolvable:$true] %s3359_s17 }
  0x3f   : > { %s3361_s3 = scalar_lea.sflag [#allocation6], %s307_s20  ;;  %p3367_p13 = pneg %p3345_p9 }
  0x42   : > { %s3354_s29 = scalar_lea.hbm %s3771_s1, %s3343_s18  ;;  %s2975_s10 = scalar_lea.hbm %s3771_s1, 512 }
  0x43   : > { %s2970_s5 = scalar_lea.hbm %s3354_s29, 256  ;;  %p2976_p3 = scmp.lt.s32.totalorder %s3354_s29, %s3771_s1 }
  0x44   : > { %p2971_p2 = scmp.ne.s32.totalorder %s3354_s29, %s2970_s5  ;;  %p2977_p7 = scmp.lt.s32.totalorder %s2975_s10, %s2970_s5 }
  0x46   : > { %p2973_p0 = pnand %p3367_p13, %p2971_p2  ;;  %p2978_p1 = por %p2977_p7, %p2976_p3 }
  0x48   : > { %p2974_p5 = pneg %p2973_p0 }
  0x4a   : > { %p2979_p12 = pnand %p2978_p1, %p2974_p5 }
  0x4c   : > { %2982 = shalt.err (!%p2979_p12)
}
  0x4d   : > { %s2983_s20 = scalar_lea.vmem %s3357_s15, 256  ;;  %s3189_s27 = smov [#allocation5]  }
  0x4e   : > { %p2984_p6 = scmp.ne.s32.totalorder %s3357_s15, %s2983_s20  ;;  %s2988_s21 = sshll.u32 %s3189_s27, 4  ;;  %s2989_s21 = int_to_ptr.vmem [resolvable:$false] %s2988_s21 }
  0x4f   : > { %s2990_s22 = scalar_lea.vmem %s2989_s21, 512  ;;  %p2991_p10 = scmp.lt.s32.totalorder %s3357_s15, %s2989_s21 }
  0x50   : > { %p2986_p2 = pnand %p2984_p6, %p3367_p13  ;;  %p2992_p4 = scmp.lt.s32.totalorder %s2990_s22, %s2983_s20 }
  0x52   : > { %p2987_p0 = pneg %p2986_p2  ;;  %p2993_p8 = por %p2992_p4, %p2991_p10 }
  0x54   : > { %p2994_p11 = pnand %p2993_p8, %p2987_p0 }
  0x56   : > { %2997 = shalt.err (!%p2994_p11)
}
  0x57   : > { %s3773_s5 = smov 8   ;;  %s3774_s23 = smov 128  }
  0x58   : > { %2823 = dma.hbm_to_vmem [thread:$0]  (!%p3345_p9), %s3354_s29, 256, %s3357_s15, %s3361_s3, %s3774_s23, %s3774_s23, %s3773_s5  }
  0x59   : > { %s3009_s27 = scalar_lea.vmem %s247_s17, 512  ;;  %p3775_p6 = scmp.ne.s32.totalorder %s3764_s12, 0 }
  0x5a   : > { %p3010_p1 = scmp.ne.s32.totalorder %s247_s17, %s3009_s27  ;;  %p3017_p8 = scmp.lt.s32.totalorder %s247_s17, %s247_s17 }
  0x5b   : > { %p3776_p12 = pneg %p3775_p6  ;;  %p3018_p11 = scmp.lt.s32.totalorder %s3009_s27, %s3009_s27 }
  0x5d   : > { %p3012_p5 = pnand %p3010_p1, %p3776_p12  ;;  %p3019_p10 = por %p3018_p11, %p3017_p8 }
  0x5f   : > { %p3013_p4 = pneg %p3012_p5 }
  0x61   : > { %p3020_p3 = pnand %p3019_p10, %p3013_p4 }
  0x63   : > { %3023 = shalt.err (!%p3020_p3)
}
  0x64   : > { %2810 = dma.hbm_to_vmem [thread:$0]  (!%p3775_p6), %s3738_s4, 512, %s247_s17, [#allocation9], %s3774_s23, %s3774_s23, %s3773_s5  }
  0x65   : > { %s3190_s15 = smov [#allocation13]   ;;  %p3777_p2 = pmov %p3776_p12 }
  0x66   : > { %s272_s29 = sshll.u32 %s3190_s15, 4  ;;  %s273_s29 = int_to_ptr.vmem [resolvable:$true] %s272_s29 }
  0x67   : > { %s3035_s20 = scalar_lea.vmem %s273_s29, 512  ;;  %p3043_p12 = scmp.lt.s32.totalorder %s273_s29, %s273_s29 }
  0x68   : > { %p3036_p7 = scmp.ne.s32.totalorder %s273_s29, %s3035_s20  ;;  %p3044_p5 = scmp.lt.s32.totalorder %s3035_s20, %s3035_s20 }
  0x6a   : > { %p3038_p0 = pnand %p3036_p7, %p3777_p2  ;;  %p3045_p4 = por %p3044_p5, %p3043_p12 }
  0x6c   : > { %p3039_p1 = pneg %p3038_p0 }
  0x6e   : > { %p3046_p8 = pnand %p3045_p4, %p3039_p1 }
  0x70   : > { %3049 = shalt.err (!%p3046_p8)
}
  0x71   : > { %2816 = dma.hbm_to_vmem [thread:$0]  (!%p3775_p6), %s3740_s6, 512, %s273_s29, [#allocation12], %s3774_s23, %s3774_s23, %s3773_s5  }
  0x72   : > { %s3420_s10 = scalar_lea.hbm %s3734_s0, %s3343_s18  ;;  %s290_s12 = scalar_lea.vmem [#allocation2], %s3340_s14 }
  0x73   : > { %s297_s16 = sshll.u32 %s290_s12, 4  ;;  %s3778_s15 = sand.u32 1, %s3178_s26   ;;  %s3423_s16 = int_to_ptr.vmem [resolvable:$true] %s297_s16 }
  0x74   : > { %s287_s20 = scalar_lea.sflag [#allocation3], %s3778_s15  ;;  %s3050_s17 = scalar_lea.hbm %s3420_s10, 256 }
  0x75   : > { %p3051_p11 = scmp.ne.s32.totalorder %s3420_s10, %s3050_s17  ;;  %s3055_s22 = scalar_lea.hbm %s3734_s0, 512 }
  0x76   : > { %p3056_p6 = scmp.lt.s32.totalorder %s3420_s10, %s3734_s0  ;;  %p3057_p7 = scmp.lt.s32.totalorder %s3055_s22, %s3050_s17 }
  0x77   : > { %p3053_p10 = pnand %p3051_p11, %p3367_p13 }
  0x78   : > { %p3058_p2 = por %p3057_p7, %p3056_p6 }
  0x79   : > { %p3054_p3 = pneg %p3053_p10 }
  0x7b   : > { %p3059_p0 = pnand %p3058_p2, %p3054_p3 }
  0x7d   : > { %3062 = shalt.err (!%p3059_p0)
}
  0x7e   : > { %s3063_s12 = scalar_lea.vmem %s3423_s16, 256  ;;  %s3191_s15 = smov [#allocation2]  }
  0x7f   : > { %p3064_p1 = scmp.ne.s32.totalorder %s3423_s16, %s3063_s12  ;;  %s3068_s29 = sshll.u32 %s3191_s15, 4  ;;  %s3069_s29 = int_to_ptr.vmem [resolvable:$false] %s3068_s29 }
  0x80   : > { %s3070_s21 = scalar_lea.vmem %s3069_s29, 512  ;;  %p3071_p4 = scmp.lt.s32.totalorder %s3423_s16, %s3069_s29 }
  0x81   : > { %p3066_p12 = pnand %p3064_p1, %p3367_p13  ;;  %p3072_p8 = scmp.lt.s32.totalorder %s3070_s21, %s3063_s12 }
  0x83   : > { %p3067_p5 = pneg %p3066_p12  ;;  %p3073_p11 = por %p3072_p8, %p3071_p4 }
  0x85   : > { %p3074_p10 = pnand %p3073_p11, %p3067_p5 }
  0x87   : > { %3077 = shalt.err (!%p3074_p10)
}
  0x88   : > { %2820 = dma.hbm_to_vmem [thread:$0]  (!%p3345_p9), %s3420_s10, 256, %s3423_s16, %s287_s20, %s3774_s23, %s3774_s23, %s3773_s5  }
  0x89   : > { %s3454_s22 = scalar_lea.hbm %s3736_s2, %s3343_s18  ;;  %s332_s27 = scalar_lea.vmem [#allocation7], %s3340_s14 }
  0x8a   : > { %s339_s12 = sshll.u32 %s332_s27, 4  ;;  %s3078_s15 = scalar_lea.hbm %s3454_s22, 256  ;;  %s340_s12 = int_to_ptr.vmem [resolvable:$true] %s339_s12 }
  0x8b   : > { %p3079_p3 = scmp.ne.s32.totalorder %s3454_s22, %s3078_s15  ;;  %s3083_s10 = scalar_lea.hbm %s3736_s2, 512 }
  0x8c   : > { %p3084_p2 = scmp.lt.s32.totalorder %s3454_s22, %s3736_s2  ;;  %p3085_p0 = scmp.lt.s32.totalorder %s3083_s10, %s3078_s15 }
  0x8d   : > { %p3081_p6 = pnand %p3079_p3, %p3367_p13 }
  0x8e   : > { %p3086_p1 = por %p3085_p0, %p3084_p2 }
  0x8f   : > { %p3082_p7 = pneg %p3081_p6 }
  0x91   : > { %p3087_p12 = pnand %p3086_p1, %p3082_p7 }
  0x93   : > { %3090 = shalt.err (!%p3087_p12)
}
  0x94   : > { %s3091_s14 = scalar_lea.vmem %s340_s12, 256  ;;  %s3192_s18 = smov [#allocation7]  }
  0x95   : > { %p3092_p5 = scmp.ne.s32.totalorder %s340_s12, %s3091_s14  ;;  %s3096_s1 = sshll.u32 %s3192_s18, 4  ;;  %s3097_s1 = int_to_ptr.vmem [resolvable:$false] %s3096_s1 }
  0x96   : > { %s3098_s17 = scalar_lea.vmem %s3097_s1, 512  ;;  %p3099_p11 = scmp.lt.s32.totalorder %s340_s12, %s3097_s1 }
  0x97   : > { %p3094_p4 = pnand %p3092_p5, %p3367_p13  ;;  %p3100_p10 = scmp.lt.s32.totalorder %s3098_s17, %s3091_s14 }
  0x99   : > { %p3095_p8 = pneg %p3094_p4  ;;  %p3101_p3 = por %p3100_p10, %p3099_p11 }
  0x9b   : > { %p3102_p6 = pnand %p3101_p3, %p3095_p8 }
  0x9d   : > { %3105 = shalt.err (!%p3102_p6)
}
  0x9e   : > { %2826 = dma.hbm_to_vmem [thread:$0]  (!%p3345_p9), %s3454_s22, 256, %s340_s12, %s3361_s3, %s3774_s23, %s3774_s23, %s3773_s5  }
  0x9f   : > { %p3779_p13 = scmp.ne.s32.totalorder %s3763_s9, 0 }
  0xa0   : > { %s3480_s13 = sand.u32 (!%p3779_p13), 1, %s3174_s25   ;;  %p3780_p7 = scmp.ne.s32.totalorder (!%p3779_p13), %s3761_s30, 0 }
  0xa1   : > { %351 = sbr.rel (%p3779_p13) target bundleno = 3211 (0xc8b), region = 48  ;;  %s3483_s27 = sshll.u32 (!%p3779_p13), %s3480_s13, 4 }
  0xa2   : > { %s354_s15 = scalar_lea.sflag (!%p3779_p13), [#allocation3], %s3480_s13  ;;  %s357_s19 = scalar_lea.vmem (!%p3779_p13), [#allocation2], %s3483_s27 }
  0xa6   : > { %3149 = dma.done.wait (%p3780_p7), %s354_s15, 256  }
  0xa7   : > { %3151 = vsyncadd (%p3780_p7), %s354_s15, 4294967040  ;;  %s362_s3 = sand.u32 1, %s3262_s28   ;;  %s366_s5 = scalar_lea.vmem [#allocation5], %s3483_s27 }
  0xa8   : > { %s363_s9 = scalar_lea.sflag [#allocation6], %s362_s3 }
  0xa9   : > { %3153 = dma.done.wait (%p3780_p7), %s363_s9, 512  }
  0xaa   : > { %3155 = vsyncadd (%p3780_p7), %s363_s9, 4294966784  ;;  %s375_s23 = scalar_lea.vmem [#allocation7], %s3483_s27  ;;  %p3781_p9 = scmp.eq.s32.totalorder %s3262_s28, 0 }
  0xac   : > { %3157 = dma.done.wait (%p3781_p9), [#allocation9], 1024   ;;  %p3782_p2 = pmov %p3781_p9 }
  0xae   : > { %3159 = vsyncadd (%p3782_p2), [#allocation9], 4294966272  ;;  %p3783_p0 = pmov %p3782_p2 }
  0xb0   : > { %3161 = dma.done.wait (%p3783_p0), [#allocation12], 1024   ;;  %p3784_p1 = pmov %p3783_p0 }
  0xb1   : > { %v531_v0 = vld [vmem:[#allocation10 + $0x18] sm:$0xff]  ;;  %v530_v2 = vld [vmem:[#allocation10 + $0x10] sm:$0xff]  ;;  %v529_v4 = vld [vmem:[#allocation10 + $0x8] sm:$0xff]  ;;  %vm446_vm0 = vcmask 261120   ;;  %v3193_v12 = vmov 0.0   ;;  %vm3194_vm1 = vmmov 0  }
  0xb2   : > { %3163 = vsyncadd (%p3784_p1), [#allocation12], 4294966272  ;;  %v445_v1 = vld [vmem:[#allocation8 + $0x18] sm:$0xff]  ;;  %2658 = vmatprep.subr.mxu1 %v531_v0  ;;  %v444_v3 = vld [vmem:[#allocation8 + $0x10] sm:$0xff]  ;;  %vm698_vm2 = vcmask 64512   ;;  %s3195_s30 = smov 120  }
  0xb3   : > { %2647 = vmatprep.subr.mxu0 %v445_v1  ;;  %2659 = vmatpush3.msra.mxu1 %v531_v0  ;;  %v443_v5 = vld [vmem:[#allocation8 + $0x8] sm:$0xff]  ;;  %v528_v6 = vld [vmem:[#allocation10] sm:$0xff]  ;;  %v616_v17 = vld [vmem:[#allocation11 + $0x18] sm:$0xff]  ;;  %s3196_s22 = smov 112   ;;  %s3197_s12 = smov 104  }
  0xb4   : > { %2648 = vmatpush3.msra.mxu0 %v445_v1  ;;  %2660 = vmatprep.subr.mxu1 %v530_v2  ;;  %v438_v7 = vld [vmem:[%s366_s5] sm:$0xff]  ;;  %v439_v9 = vld [vmem:[%s366_s5 + $0x8] sm:$0xff]  ;;  %s431_s29 = scalar_lea.vmem [#allocation14], %s3483_s27  ;;  %s2584_s10 = sshll.u32 %s3262_s28, 8 }
  0xb5   : > { %2649 = vmatprep.subr.mxu0 %v444_v3  ;;  %2661 = vmatpush3.msra.mxu1 %v530_v2  ;;  %v442_v8 = vld [vmem:[#allocation8] sm:$0xff]  ;;  %v437_v11 = vld [vmem:[%s357_s19 + $0x8] sm:$0xff]  ;;  %v615_v18 = vld [vmem:[#allocation11 + $0x10] sm:$0xff]  ;;  %s2359_s21 = sshll.u32 %s431_s29, 4  ;;  %s3689_s14 = scalar_lea.hbm %s3741_s7, %s2584_s10  ;;  %s3684_s21 = int_to_ptr.vmem [resolvable:$true] %s2359_s21 }
  0xb6   : > { %2650 = vmatpush3.msra.mxu0 %v444_v3  ;;  %2662 = vmatprep.subr.mxu1 %v529_v4  ;;  %v436_v10 = vld [vmem:[%s357_s19] sm:$0xff]  ;;  %v614_v20 = vld [vmem:[#allocation11 + $0x8] sm:$0xff]  ;;  %s2346_s18 = scalar_lea.sflag [#allocation4], %s3480_s13  ;;  %s3106_s28 = scalar_lea.vmem %s3684_s21, 256 }
  0xb7   : > { %2651 = vmatprep.subr.mxu0 %v443_v5  ;;  %2663 = vmatpush3.msra.mxu1 %v529_v4  ;;  %v440_v19 = vld [vmem:[%s375_s23] sm:$0xff]  ;;  %v441_v22 = vld [vmem:[%s375_s23 + $0x8] sm:$0xff]  ;;  %p3107_p12 = scmp.ne.s32.totalorder %s3684_s21, %s3106_s28  ;;  %p3785_p5 = scmp.ne.s32.totalorder %s3768_s11, 0 }
  0xb8   : > { %2652 = vmatpush3.msra.mxu0 %v443_v5  ;;  %2664 = vmatprep.subr.mxu1 %v528_v6  ;;  %v613_v21 = vld [vmem:[#allocation11] sm:$0xff]  ;;  %s3198_s1 = smov [#allocation14]  }
  0xb9   : > { %2666 = vmatprep.mubr.msk.f32.mxu1 %vm446_vm0, %v438_v7  ;;  %2665 = vmatpush3.msra.mxu1 %v528_v6  ;;  %p3108_p4 = pnand %p3107_p12, %p3785_p5  ;;  %s3110_s17 = sshll.u32 %s3198_s1, 4  ;;  %s3111_s17 = int_to_ptr.vmem [resolvable:$false] %s3110_s17 }
  0xba   : > { %2653 = vmatprep.subr.mxu0 %v442_v8  ;;  %2667 = vmatmul.mubr.msk.f32.vlgmr.msra.gmra.mxu1 %vm446_vm0, %v439_v9  ;;  %s3112_s27 = scalar_lea.vmem %s3111_s17, 512  ;;  %p3113_p11 = scmp.lt.s32.totalorder %s3684_s21, %s3111_s17 }
  0xbb   : > { %2654 = vmatpush3.msra.mxu0 %v442_v8  ;;  %2655 = vmatprep.mubr.msk.f32.mxu0 %vm446_vm0, %v436_v10  ;;  %v1019_v8 = vld [vmem:[#allocation13] sm:$0xff]  ;;  %p3109_p8 = pneg %p3108_p4  ;;  %p3114_p10 = scmp.lt.s32.totalorder %s3112_s27, %s3106_s28 }
  0xbc   : > { %2656 = vmatmul.mubr.msk.f32.vlgmr.msra.gmra.mxu0 %vm446_vm0, %v437_v11  ;;  %2680 = vmatprep.subr.mxu1 %v3193_v12 }
  0xbd   : > { %2682 = vmatprep.mubr.msk.f32.mxu1 %vm3194_vm1, %v3193_v12  ;;  %2669 = vmatprep.subr.mxu0 %v616_v17  ;;  %p3115_p3 = por %p3114_p10, %p3113_p11 }
  0xbe   : > { %2670 = vmatpush3.msra.mxu0 %v616_v17  ;;  %2677 = vmatprep.mubr.msk.f32.mxu0 %vm446_vm0, %v440_v19 }
  0xbf   : > { %2671 = vmatprep.subr.mxu0 %v615_v18  ;;  %p3116_p6 = pnand %p3115_p3, %p3109_p8 }
  0xc0   : > { %2672 = vmatpush3.msra.mxu0 %v615_v18 }
  0xc1   : > { %2673 = vmatprep.subr.mxu0 %v614_v20 }
  0xc2   : > { %2674 = vmatpush3.msra.mxu0 %v614_v20 }
  0xc3   : > { %2675 = vmatprep.subr.mxu0 %v613_v21 }
  0xc4   : > { %2676 = vmatpush3.msra.mxu0 %v613_v21 }
  0xc5   : > { %2678 = vmatmul.mubr.msk.f32.vlgmr.msra.gmra.mxu0 %vm446_vm0, %v441_v22  ;;  %2690 = vmatprep.subr.mxu0 %v3193_v12 }
  0xc6   : > { %2692 = vmatprep.mubr.msk.f32.mxu0 %vm3194_vm1, %v3193_v12 }
 0x17a   : > { %v3517_v13 = vpop.f32.mrf.mxu1 }
 0x17b   : > { %1100 = vrot.lane.b32.xlu1 %v3517_v13, %s3195_s30 }
 0x17c   : > { %v3521_v14 = vpop.f32.mrf.mxu0  ;;  %v3523_v15 = vpop.f32.mrf.mxu1 }
 0x17d   : > { %2681 = vmatpush3.xpose.msk.msra.mxu1 %vm698_vm2, %v3523_v15 }
 0x17e   : > { %v3527_v16 = vpop.f32.mrf.mxu0  ;;  %2685 = vmatprep.subr.mxu1 %v3193_v12 }
 0x17f   : > { %1020 = vrot.lane.b32.xlu1 %v3527_v16, %s3195_s30 }
 0x180   : > { %2683 = vmatmul.mubr.msk.f32.vlgmr.msra.gmra.mxu1 %vm698_vm2, %v3527_v16 }
 0x181   : > { %2686 = vmatpush3.xpose.msk.msra.mxu1 %vm698_vm2, %v3517_v13  ;;  %2687 = vmatprep.mubr.msk.f32.mxu1 %vm3194_vm1, %v3193_v12 }
 0x182   : > { %2695 = vmatprep.subr.mxu1 %v3193_v12 }
 0x184   : > { %2688 = vmatmul.mubr.msk.f32.vlgmr.msra.gmra.mxu1 %vm698_vm2, %v3521_v14 }
 0x185   : > { %2697 = vmatprep.mubr.msk.f32.mxu1 %vm3194_vm1, %v3193_v12  ;;  %v3558_v39 = vpop.f32.mrf.mxu0 }
 0x186   : > { %2696 = vmatpush3.msra.mxu1 %v3558_v39 }
 0x187   : > { %v3561_v40 = vpop.f32.mrf.mxu0  ;;  %2705 = vmatprep.subr.mxu1 %v3193_v12 }
 0x188   : > { %2691 = vmatpush3.msra.mxu0 %v3561_v40 }
 0x189   : > { %2700 = vmatprep.subr.mxu0 %v3193_v12 }
 0x1ed   : > { %v1101_v41 = vpop.permute.xlu1 %1100 }
 0x1f1   : > { %v1021_v42 = vpop.permute.xlu1 %1020 }
 0x240   : > { %v771_v23 = vpop.f32.mrf.mxu1 }
 0x241   : > { %v851_v24 = vsel %vm698_vm2, %v771_v23, -inf }
 0x242   : > { %852 = vmax.xlane.f32.xlu0 %v851_v24  ;;  %v2684_v25 = vpop.f32.mrf.mxu1  ;;  %v1352_v24 = vld [vmem:[#allocation13 + $0x8] sm:$0xff] }
 0x244   : > { %v847_v26 = vpop.f32.mrf.mxu1 }
 0x245   : > { %v854_v27 = vsel %vm698_vm2, %v847_v26, -inf }
 0x246   : > { %855 = vmax.xlane.f32.xlu0 %v854_v27  ;;  %v2689_v28 = vpop.f32.mrf.mxu1 }
 0x25c   : > { %1022 = vrot.lane.b32.xlu0 %v3523_v15, %s3195_s30 }
 0x2cb   : > { %v853_v29 = vpop.xlane.xlu0 %852 }
 0x2cc   : > { %v857_v30 = vsub.f32 %v771_v23, %v853_v29 }
 0x2ce   : > { %v859_v31 = vmul.f32 1.442695, %v857_v30 }
 0x2cf   : > { %v856_v32 = vpop.xlane.xlu0 %855 }
 0x2d0   : > { %2886 = vpow2.f32 %v859_v31  ;;  %v858_v33 = vsub.f32 %v847_v26, %v856_v32 }
 0x2d2   : > { %v861_v34 = vmul.f32 1.442695, %v858_v33 }
 0x2d3   : > { %v1023_v47 = vpop.permute.xlu0 %1022 }
 0x2d4   : > { %2888 = vpow2.f32 %v861_v34 }
 0x2dd   : > { %v2887_v35 = vpop.eup %2886 }
 0x2de   : > { %v863_v36 = vsel %vm698_vm2, %v2887_v35, 0.0 }
 0x2df   : > { %864 = vadd.xlane.f32.xlu1 %v863_v36 }
 0x2e1   : > { %v2889_v37 = vpop.eup %2888 }
 0x2e2   : > { %v866_v38 = vsel %vm698_vm2, %v2889_v37, 0.0 }
 0x2e3   : > { %867 = vadd.xlane.f32.xlu1 %v866_v38 }
 0x2f4   : > { %1098 = vrot.lane.b32.xlu1 %v3521_v14, %s3195_s30 }
 0x368   : > { %v865_v43 = vpop.xlane.xlu1 %864 }
 0x369   : > { %2890 = vrcp.f32 %v865_v43 }
 0x36c   : > { %v868_v44 = vpop.xlane.xlu1 %867 }
 0x36d   : > { %2892 = vrcp.f32 %v868_v44 }
 0x370   : > { %v1099_v50 = vpop.permute.xlu1 %1098 }
 0x376   : > { %v2891_v45 = vpop.eup %2890 }
 0x377   : > { %v871_v46 = vmul.f32 %v2891_v45, %v2887_v35 }
 0x379   : > { %2693 = vmatmul.mubr.msk.f32.vlgmr.msra.gmra.mxu0 %vm698_vm2, %v871_v46 }
 0x37a   : > { %v2893_v48 = vpop.eup %2892  ;;  %2701 = vmatpush3.xpose.msk.msra.mxu0 %vm698_vm2, %v1023_v47  ;;  %2702 = vmatprep.mubr.msk.f32.mxu0 %vm3194_vm1, %v3193_v12 }
 0x37b   : > { %v872_v49 = vmul.f32 %v2893_v48, %v2889_v37  ;;  %2710 = vmatprep.subr.mxu0 %v3193_v12 }
 0x37d   : > { %2698 = vmatmul.mubr.msk.f32.vlgmr.msra.gmra.mxu1 %vm698_vm2, %v872_v49  ;;  %2703 = vmatmul.mubr.msk.f32.vlgmr.msra.gmra.mxu0 %vm698_vm2, %v1021_v42 }
 0x37e   : > { %2706 = vmatpush3.xpose.msk.msra.mxu1 %vm698_vm2, %v1101_v41  ;;  %2707 = vmatprep.mubr.msk.f32.mxu1 %vm3194_vm1, %v3193_v12 }
 0x37f   : > { %2715 = vmatprep.subr.mxu1 %v3193_v12  ;;  %2712 = vmatprep.mubr.msk.f32.mxu0 %vm3194_vm1, %v3193_v12 }
 0x381   : > { %2708 = vmatmul.mubr.msk.f32.vlgmr.msra.gmra.mxu1 %vm698_vm2, %v1099_v50 }
 0x382   : > { %2717 = vmatprep.mubr.msk.f32.mxu1 %vm3194_vm1, %v3193_v12 }
 0x439   : > { %v942_v51 = vpop.f32.mrf.mxu0 }
 0x43b   : > { %v2694_v52 = vpop.f32.mrf.mxu0 }
 0x43d   : > { %v1015_v53 = vpop.f32.mrf.mxu1  ;;  %v1094_v54 = vpop.f32.mrf.mxu0 }
 0x43e   : > { %v1176_v55 = vsel %vm698_vm2, %v1094_v54, -inf }
 0x43f   : > { %v2699_v56 = vpop.f32.mrf.mxu1  ;;  %1177 = vmax.xlane.f32.xlu0 %v1176_v55  ;;  %v2704_v57 = vpop.f32.mrf.mxu0 }
 0x441   : > { %v1172_v58 = vpop.f32.mrf.mxu1 }
 0x442   : > { %v1179_v59 = vsel %vm698_vm2, %v1172_v58, -inf }
 0x443   : > { %1180 = vmax.xlane.f32.xlu1 %v1179_v59  ;;  %v2709_v60 = vpop.f32.mrf.mxu1 }
 0x454   : > { %1276 = vrot.lane.b32.xlu1 %v3558_v39, %s3195_s30 }
 0x458   : > { %1517 = vrot.lane.b32.xlu1 %v3523_v15, %s3196_s22 }
 0x45c   : > { %1595 = vrot.lane.b32.xlu1 %v3517_v13, %s3196_s22 }
 0x460   : > { %1593 = vrot.lane.b32.xlu1 %v3521_v14, %s3196_s22 }
 0x4c8   : > { %v1178_v61 = vpop.xlane.xlu0 %1177 }
 0x4c9   : > { %v1182_v62 = vsub.f32 %v1094_v54, %v1178_v61  ;;  %v1845_v61 = vld [vmem:[#allocation13 + $0x10] sm:$0xff] }
 0x4cb   : > { %v1184_v63 = vmul.f32 1.442695, %v1182_v62 }
 0x4cc   : > { %v1181_v0 = vpop.xlane.xlu1 %1180 }
 0x4cd   : > { %2894 = vpow2.f32 %v1184_v63  ;;  %v1183_v1 = vsub.f32 %v1172_v58, %v1181_v0 }
 0x4cf   : > { %v1186_v2 = vmul.f32 1.442695, %v1183_v1 }
 0x4d0   : > { %v1277_v3 = vpop.permute.xlu1 %1276 }
 0x4d1   : > { %2896 = vpow2.f32 %v1186_v2  ;;  %2716 = vmatpush3.msra.mxu1 %v1277_v3 }
 0x4d2   : > { %2725 = vmatprep.subr.mxu1 %v1019_v8 }
 0x4d4   : > { %v1518_v19 = vpop.permute.xlu1 %1517 }
 0x4d8   : > { %v1596_v22 = vpop.permute.xlu1 %1595 }
 0x4da   : > { %v2895_v4 = vpop.eup %2894 }
 0x4db   : > { %v1188_v5 = vsel %vm698_vm2, %v2895_v4, 0.0 }
 0x4dc   : > { %1189 = vadd.xlane.f32.xlu0 %v1188_v5  ;;  %v1594_v23 = vpop.permute.xlu1 %1593 }
 0x4de   : > { %v2897_v6 = vpop.eup %2896 }
 0x4df   : > { %v1191_v7 = vsel %vm698_vm2, %v2897_v6, 0.0 }
 0x4e0   : > { %1192 = vadd.xlane.f32.xlu0 %v1191_v7 }
 0x4f6   : > { %1199 = vrot.lane.b32.xlu0 %v3561_v40, %s3195_s30 }
 0x4fa   : > { %1515 = vrot.lane.b32.xlu0 %v3527_v16, %s3196_s22 }
 0x565   : > { %v1190_v9 = vpop.xlane.xlu0 %1189 }
 0x566   : > { %2898 = vrcp.f32 %v1190_v9 }
 0x569   : > { %v1193_v10 = vpop.xlane.xlu0 %1192 }
 0x56a   : > { %2900 = vrcp.f32 %v1193_v10 }
 0x56d   : > { %v1200_v11 = vpop.permute.xlu0 %1199 }
 0x56e   : > { %2711 = vmatpush3.msra.mxu0 %v1200_v11 }
 0x56f   : > { %2720 = vmatprep.subr.mxu0 %v1352_v24 }
 0x571   : > { %v1516_v29 = vpop.permute.xlu0 %1515 }
 0x573   : > { %v2899_v17 = vpop.eup %2898 }
 0x574   : > { %v1196_v18 = vmul.f32 %v2899_v17, %v2895_v4 }
 0x576   : > { %2713 = vmatmul.mubr.msk.f32.vlgmr.msra.gmra.mxu0 %vm698_vm2, %v1196_v18 }
 0x577   : > { %v2901_v20 = vpop.eup %2900  ;;  %2721 = vmatpush3.msra.mxu0 %v1352_v24 }
 0x578   : > { %v1197_v21 = vmul.f32 %v2901_v20, %v2897_v6  ;;  %2730 = vmatprep.subr.mxu0 %v3193_v12 }
 0x57a   : > { %2718 = vmatmul.mubr.msk.f32.vlgmr.msra.gmra.mxu1 %vm698_vm2, %v1197_v21 }
 0x57b   : > { %2727 = vmatprep.mubr.msk.f32.mxu1 %vm698_vm2, %v942_v51  ;;  %2726 = vmatpush3.msra.mxu1 %v1019_v8 }
 0x57c   : > { %2735 = vmatprep.subr.mxu1 %v3193_v12 }
 0x57e   : > { %2728 = vmatmul.mubr.msk.f32.vlgmr.msra.gmra.mxu1 %vm698_vm2, %v1015_v53 }
 0x57f   : > { %2736 = vmatpush3.xpose.msk.msra.mxu1 %vm698_vm2, %v1596_v22  ;;  %2737 = vmatprep.mubr.msk.f32.mxu1 %vm3194_vm1, %v3193_v12 }
 0x580   : > { %2745 = vmatprep.subr.mxu1 %v3193_v12 }
 0x582   : > { %2738 = vmatmul.mubr.msk.f32.vlgmr.msra.gmra.mxu1 %vm698_vm2, %v1594_v23 }
 0x583   : > { %2747 = vmatprep.mubr.msk.f32.mxu1 %vm3194_vm1, %v3193_v12 }
 0x636   : > { %v1271_v25 = vpop.f32.mrf.mxu0 }
 0x637   : > { %2722 = vmatprep.mubr.msk.f32.mxu0 %vm698_vm2, %v1271_v25 }
 0x638   : > { %v2714_v26 = vpop.f32.mrf.mxu0 }
 0x63a   : > { %v1348_v27 = vpop.f32.mrf.mxu1 }
 0x63b   : > { %2723 = vmatmul.mubr.msk.f32.vlgmr.msra.gmra.mxu0 %vm698_vm2, %v1348_v27 }
 0x63c   : > { %2731 = vmatpush3.xpose.msk.msra.mxu0 %vm698_vm2, %v1518_v19  ;;  %v2719_v28 = vpop.f32.mrf.mxu1  ;;  %2732 = vmatprep.mubr.msk.f32.mxu0 %vm3194_vm1, %v3193_v12 }
 0x63d   : > { %2740 = vmatprep.subr.mxu0 %v3193_v12 }
 0x63e   : > { %v3619_v30 = vpop.f32.mrf.mxu1 }
 0x63f   : > { %2733 = vmatmul.mubr.msk.f32.vlgmr.msra.gmra.mxu0 %vm698_vm2, %v1516_v29 }
 0x640   : > { %v3622_v31 = vpop.f32.mrf.mxu1  ;;  %2742 = vmatprep.mubr.msk.f32.mxu0 %vm3194_vm1, %v3193_v12 }
 0x642   : > { %v1667_v32 = vpop.f32.mrf.mxu1 }
 0x643   : > { %v1674_v33 = vsel %vm698_vm2, %v1667_v32, -inf }
 0x644   : > { %1675 = vmax.xlane.f32.xlu1 %v1674_v33  ;;  %v2739_v34 = vpop.f32.mrf.mxu1 }
 0x645   : > { %v2259_v34 = vld [vmem:[#allocation13 + $0x18] sm:$0xff] }
 0x655   : > { %1769 = vrot.lane.b32.xlu1 %v3558_v39, %s3196_s22 }
 0x659   : > { %1931 = vrot.lane.b32.xlu1 %v3523_v15, %s3197_s12 }
 0x65d   : > { %2009 = vrot.lane.b32.xlu1 %v3517_v13, %s3197_s12 }
 0x661   : > { %2007 = vrot.lane.b32.xlu1 %v3521_v14, %s3197_s12 }
 0x6cd   : > { %v1676_v35 = vpop.xlane.xlu1 %1675 }
 0x6ce   : > { %v1678_v37 = vsub.f32 %v1667_v32, %v1676_v35 }
 0x6d0   : > { %v1681_v38 = vmul.f32 1.442695, %v1678_v37 }
 0x6d1   : > { %v1770_v36 = vpop.permute.xlu1 %1769 }
 0x6d2   : > { %2746 = vmatpush3.msra.mxu1 %v1770_v36  ;;  %2902 = vpow2.f32 %v1681_v38 }
 0x6d3   : > { %2755 = vmatprep.subr.mxu1 %v3193_v12 }
 0x6d5   : > { %v1932_v53 = vpop.permute.xlu1 %1931 }
 0x6d9   : > { %v2010_v0 = vpop.permute.xlu1 %2009 }
 0x6dd   : > { %v2008_v3 = vpop.permute.xlu1 %2007 }
 0x6df   : > { %v2903_v44 = vpop.eup %2902 }
 0x6e0   : > { %v1686_v14 = vsel %vm698_vm2, %v2903_v44, 0.0 }
 0x6fb   : > { %v3636_v41 = vpop.f32.mrf.mxu0 }
 0x6fc   : > { %v1512_v9 = vadd.f32 %v3619_v30, %v3636_v41 }
 0x6fd   : > { %v3638_v42 = vpop.f32.mrf.mxu0 }
 0x6fe   : > { %v1507_v11 = vadd.f32 %v3622_v31, %v3638_v42 }
 0x6ff   : > { %v1589_v43 = vpop.f32.mrf.mxu0 }
 0x700   : > { %v1671_v15 = vsel %vm698_vm2, %v1589_v43, -inf }
 0x701   : > { %1672 = vmax.xlane.f32.xlu0 %v1671_v15  ;;  %v2734_v13 = vpop.f32.mrf.mxu0 }
 0x705   : > { %1687 = vadd.xlane.f32.xlu0 %v1686_v14 }
 0x78a   : > { %v1673_v45 = vpop.xlane.xlu0 %1672 }
 0x78b   : > { %v1677_v46 = vsub.f32 %v1589_v43, %v1673_v45 }
 0x78d   : > { %v1679_v47 = vmul.f32 1.442695, %v1677_v46 }
 0x78e   : > { %v1688_v48 = vpop.xlane.xlu0 %1687 }
 0x78f   : > { %2904 = vpow2.f32 %v1679_v47 }
 0x790   : > { %2906 = vrcp.f32 %v1688_v48 }
 0x79c   : > { %v2905_v49 = vpop.eup %2904 }
 0x79d   : > { %v2907_v50 = vpop.eup %2906  ;;  %v1683_v51 = vsel %vm698_vm2, %v2905_v49, 0.0 }
 0x79e   : > { %1684 = vadd.xlane.f32.xlu0 %v1683_v51  ;;  %v1692_v52 = vmul.f32 %v2907_v50, %v2903_v44 }
 0x7a0   : > { %2748 = vmatmul.mubr.msk.f32.vlgmr.msra.gmra.mxu1 %vm698_vm2, %v1692_v52 }
 0x7a1   : > { %2756 = vmatpush3.xpose.msk.msra.mxu1 %vm698_vm2, %v1932_v53  ;;  %2757 = vmatprep.mubr.msk.f32.mxu1 %vm3194_vm1, %v3193_v12 }
 0x7a2   : > { %2765 = vmatprep.subr.mxu1 %v3193_v12 }
 0x7b4   : > { %1693 = vrot.lane.b32.xlu0 %v3561_v40, %s3196_s22 }
 0x7b8   : > { %1929 = vrot.lane.b32.xlu0 %v3527_v16, %s3197_s12 }
 0x827   : > { %v1685_v54 = vpop.xlane.xlu0 %1684 }
 0x828   : > { %2908 = vrcp.f32 %v1685_v54 }
 0x82b   : > { %v1694_v55 = vpop.permute.xlu0 %1693 }
 0x82c   : > { %2741 = vmatpush3.msra.mxu0 %v1694_v55 }
 0x82d   : > { %2750 = vmatprep.subr.mxu0 %v1845_v61 }
 0x82f   : > { %v1930_v56 = vpop.permute.xlu0 %1929 }
 0x830   : > { %2758 = vmatmul.mubr.msk.f32.vlgmr.msra.gmra.mxu1 %vm698_vm2, %v1930_v56 }
 0x831   : > { %2767 = vmatprep.mubr.msk.f32.mxu1 %vm3194_vm1, %v3193_v12 }
 0x835   : > { %v2909_v57 = vpop.eup %2908 }
 0x836   : > { %v1691_v58 = vmul.f32 %v2909_v57, %v2905_v49 }
 0x838   : > { %2743 = vmatmul.mubr.msk.f32.vlgmr.msra.gmra.mxu0 %vm698_vm2, %v1691_v58 }
 0x839   : > { %2751 = vmatpush3.msra.mxu0 %v1845_v61 }
 0x83a   : > { %2760 = vmatprep.subr.mxu0 %v3193_v12 }
 0x860   : > { %v1841_v59 = vpop.f32.mrf.mxu1 }
 0x862   : > { %v2749_v60 = vpop.f32.mrf.mxu1 }
 0x8f0   : > { %v2003_v16 = vpop.f32.mrf.mxu1 }
 0x8f1   : > { %v2085_v62 = vsel %vm698_vm2, %v2003_v16, -inf }
 0x8f2   : > { %2086 = vmax.xlane.f32.xlu0 %v2085_v62  ;;  %v2759_v63 = vpop.f32.mrf.mxu1 }
 0x8f8   : > { %v1765_v1 = vpop.f32.mrf.mxu0 }
 0x8f9   : > { %2752 = vmatprep.mubr.msk.f32.mxu0 %vm698_vm2, %v1765_v1 }
 0x8fa   : > { %v2744_v2 = vpop.f32.mrf.mxu0  ;;  %2753 = vmatmul.mubr.msk.f32.vlgmr.msra.gmra.mxu0 %vm698_vm2, %v1841_v59 }
 0x8fb   : > { %2761 = vmatpush3.xpose.msk.msra.mxu0 %vm698_vm2, %v2010_v0  ;;  %2762 = vmatprep.mubr.msk.f32.mxu0 %vm3194_vm1, %v3193_v12 }
 0x8fc   : > { %2770 = vmatprep.subr.mxu0 %v3193_v12 }
 0x8fe   : > { %2763 = vmatmul.mubr.msk.f32.vlgmr.msra.gmra.mxu0 %vm698_vm2, %v2008_v3 }
 0x8ff   : > { %2772 = vmatprep.mubr.msk.f32.mxu0 %vm3194_vm1, %v3193_v12 }
 0x97b   : > { %v2087_v4 = vpop.xlane.xlu0 %2086 }
 0x97c   : > { %v2091_v5 = vsub.f32 %v2003_v16, %v2087_v4 }
 0x97e   : > { %v2093_v6 = vmul.f32 1.442695, %v2091_v5 }
 0x980   : > { %2910 = vpow2.f32 %v2093_v6 }
 0x98d   : > { %v2911_v7 = vpop.eup %2910 }
 0x98e   : > { %v2097_v8 = vsel %vm698_vm2, %v2911_v7, 0.0 }
 0x98f   : > { %2098 = vadd.xlane.f32.xlu0 %v2097_v8 }
 0x9ba   : > { %v2754_v10 = vpop.f32.mrf.mxu0 }
 0x9bb   : > { %v1928_v17 = vadd.f32 %v2754_v10, %v1512_v9 }
 0x9bc   : > { %v1918_v18 = vpop.f32.mrf.mxu0 }
 0x9bd   : > { %v1927_v19 = vadd.f32 %v1918_v18, %v1507_v11 }
 0x9be   : > { %v2081_v20 = vpop.f32.mrf.mxu0 }
 0x9bf   : > { %v2088_v12 = vsel %vm698_vm2, %v2081_v20, -inf }
 0x9c0   : > { %2089 = vmax.xlane.f32.xlu1 %v2088_v12  ;;  %v2764_v21 = vpop.f32.mrf.mxu0 }
 0x9d1   : > { %2183 = vrot.lane.b32.xlu1 %v3558_v39, %s3197_s12 }
 0xa18   : > { %v2099_v28 = vpop.xlane.xlu0 %2098 }
 0xa49   : > { %v2090_v22 = vpop.xlane.xlu1 %2089 }
 0xa4a   : > { %v2092_v23 = vsub.f32 %v2081_v20, %v2090_v22 }
 0xa4c   : > { %v2095_v24 = vmul.f32 1.442695, %v2092_v23 }
 0xa4d   : > { %v2184_v25 = vpop.permute.xlu1 %2183 }
 0xa4e   : > { %2912 = vpow2.f32 %v2095_v24  ;;  %2771 = vmatpush3.msra.mxu0 %v2184_v25 }
 0xa4f   : > { %2914 = vrcp.f32 %v2099_v28 }
 0xa5b   : > { %v2913_v26 = vpop.eup %2912 }
 0xa5c   : > { %v2100_v27 = vsel %vm698_vm2, %v2913_v26, 0.0  ;;  %v2915_v30 = vpop.eup %2914 }
 0xa5d   : > { %2101 = vadd.xlane.f32.xlu0 %v2100_v27  ;;  %v2105_v39 = vmul.f32 %v2915_v30, %v2911_v7 }
 0xa73   : > { %2107 = vrot.lane.b32.xlu0 %v3561_v40, %s3197_s12 }
 0xae6   : > { %v2102_v29 = vpop.xlane.xlu0 %2101 }
 0xae7   : > { %2916 = vrcp.f32 %v2102_v29 }
 0xaea   : > { %v2108_v31 = vpop.permute.xlu0 %2107 }
 0xaeb   : > { %2766 = vmatpush3.msra.mxu1 %v2108_v31 }
 0xaec   : > { %2768 = vmatmul.mubr.msk.f32.vlgmr.msra.gmra.mxu1 %vm698_vm2, %v2105_v39  ;;  %2775 = vmatprep.subr.mxu1 %v2259_v34 }
 0xaed   : > { %2776 = vmatpush3.msra.mxu1 %v2259_v34 }
 0xaf4   : > { %v2917_v32 = vpop.eup %2916 }
 0xaf5   : > { %v2106_v33 = vmul.f32 %v2917_v32, %v2913_v26 }
 0xaf7   : > { %2773 = vmatmul.mubr.msk.f32.vlgmr.msra.gmra.mxu0 %vm698_vm2, %v2106_v33 }
 0xbac   : > { %v2179_v40 = vpop.f32.mrf.mxu1 }
 0xbad   : > { %2777 = vmatprep.mubr.msk.f32.mxu1 %vm698_vm2, %v2179_v40 }
 0xbae   : > { %v2769_v35 = vpop.f32.mrf.mxu1 }
 0xbb7   : > { %v2255_v36 = vpop.f32.mrf.mxu0 }
 0xbb8   : > { %2778 = vmatmul.mubr.msk.f32.vlgmr.msra.gmra.mxu1 %vm698_vm2, %v2255_v36 }
 0xbb9   : > { %v2774_v37 = vpop.f32.mrf.mxu0 }
 0xc78   : > { %v2779_v38 = vpop.f32.mrf.mxu1 }
 0xc79   : > { %v2342_v41 = vadd.f32 %v2779_v38, %v1928_v17 }
 0xc7a   : > { %v2332_v42 = vpop.f32.mrf.mxu1 }
 0xc7b   : > { %2344 = vst.msk [vmem:[%s431_s29 + $0x8] sm:$0xff] %vm446_vm0, %v2342_v41  ;;  %v2341_v43 = vadd.f32 %v2332_v42, %v1927_v19 }
 0xc7d   : > { %2343 = vst.msk [vmem:[%s431_s29] sm:$0xff] %vm446_vm0, %v2341_v43 }
 0xc7e   : > { %3119 = shalt.err (!%p3116_p6)
}
 0xc7f   : > { %s3120_s15 = scalar_lea.hbm %s3689_s14, 256  ;;  %s3124_s9 = scalar_lea.hbm %s3741_s7, 512 }
 0xc80   : > { %p3121_p13 = scmp.ne.s32.totalorder %s3689_s14, %s3120_s15  ;;  %p3125_p2 = scmp.lt.s32.totalorder %s3689_s14, %s3741_s7 }
 0xc81   : > { %p3126_p0 = scmp.lt.s32.totalorder %s3124_s9, %s3120_s15 }
 0xc82   : > { %p3122_p7 = pnand %p3121_p13, %p3785_p5 }
 0xc83   : > { %p3127_p1 = por %p3126_p0, %p3125_p2 }
 0xc84   : > { %p3123_p9 = pneg %p3122_p7 }
 0xc86   : > { %p3128_p12 = pnand %p3127_p1, %p3123_p9 }
 0xc88   : > { %3131 = shalt.err (!%p3128_p12)
}
 0xc89   : > { %s3199_s30 = smov 128   ;;  %s3200_s22 = smov 8  }
 0xc8a   : > { %2802 = dma.vmem_to_hbm [thread:$0]  (%p3785_p5), %s3684_s21, 256, %s3689_s14, %s2346_s18, %s3199_s30, %s3199_s30, %s3200_s22  }
 0xc8b PF: > { %s3786_s12 = sld [smem:[#allocation20_spill]]  ;;  %s2374_s29 = sand.u32 1, %s3170_s24  }
 0xc8c   : > { %p3787_p4 = scmp.ne.s32.totalorder %s3762_s8, 0  ;;  %s2375_s10 = scalar_lea.sflag [#allocation4], %s2374_s29 }
 0xc91   : > { %p3788_p8 = scmp.ge.s32.totalorder %s3786_s12, 2 }
 0xc93   : > { %p2828_p11 = pnand %p3788_p8, %p3787_p4 }
 0xc95   : > { %p2829_p10 = pneg %p2828_p11 }
 0xc97   : > { %3165 = dma.done.wait (%p2829_p10), %s2375_s10, 256  }
 0xc98   : > { %3167 = vsyncadd (%p2829_p10), %s2375_s10, 4294967040  ;;  %s3789_s27 = sld [smem:[#allocation21_spill]]  ;;  %s3791_s24 = smov %s3174_s25 }
 0xc99   : > { %s3790_s16 = sld [smem:[#allocation22_spill]]  ;;  %s3792_s25 = smov %s3178_s26 }
 0xc9e   : > { %p25_p3 = scmp.ge.s32.totalorder %s3789_s27, 4  }
 0xc9f   : > { %s3793_s26 = smov %s3790_s16 }
 0xca0   :  { %27 = sbr.rel (!%p25_p3) target bundleno = 13 (0xd), region = 133 }
 0xca5   :  { %2380 = vsyncpa [#allocation3], 1 }
 0xca6   :  { %2382 = vsyncpa [#allocation3 + $0x1], 1 }
 0xca7   :  { %2383 = vsyncpa [#allocation6], 1 }
 0xca8   :  { %2385 = vsyncpa [#allocation6 + $0x1], 1 }
 0xca9   :  { %2386 = vsyncpa [#allocation9], 1 }
 0xcaa   :  { %2387 = vsyncpa [#allocation12], 1 }
 0xcab   :  { %2388 = vsyncpa [#allocation4], 1 }
 0xcac   :  { %2390 = vsyncpa [#allocation4 + $0x1], 1 }

// kernel: tpu_custom_call.1
= control target key start
LH: loop header
LB: loop body
LE: loop exit
PB: predicated region body
PF: predicated region fallthrough
CT: control target
= control target key end

     0   :  { %s3734_s0 = inlined_call_operand.hbm [shape: f32[4,8,32], index: 0, kind: input, shape index: {}]   ;;  %s3735_s1 = inlined_call_operand.hbm [shape: f32[4,8,32], index: 1, kind: input, shape index: {}]   ;;  %s3736_s2 = inlined_call_operand.hbm [shape: f32[4,8,32], index: 2, kind: input, shape index: {}]   ;;  %s3737_s3 = inlined_call_operand.hbm [shape: f32[32,32], index: 3, kind: input, shape index: {}]   ;;  %s3738_s4 = inlined_call_operand.hbm [shape: f32[32,32], index: 4, kind: input, shape index: {}]   ;;  %s3739_s5 = inlined_call_operand.hbm [shape: f32[32,32], index: 5, kind: input, shape index: {}]   ;;  %s3740_s6 = inlined_call_operand.hbm [shape: f32[32,32], index: 6, kind: input, shape index: {}]   ;;  %s3741_s7 = inlined_call_operand.hbm [shape: f32[4,8,32], index: 7, kind: output, shape index: {}]  }
   0x1   :  { %3757 = sst [smem:[#allocation23_spill]] %s3735_s1 }
   0x2   :  { %3758 = sst [smem:[#allocation24_spill]] %s3737_s3 }
   0x3   :  { %3759 = sst [smem:[#allocation25_spill]] %s3739_s5 }
   0x4   :  { %12 = vsyncpa [#allocation3], 0 }
   0x5   :  { %14 = vsyncpa [#allocation3 + $0x1], 0 }
   0x6   :  { %15 = vsyncpa [#allocation6], 0 }
   0x7   :  { %17 = vsyncpa [#allocation6 + $0x1], 0 }
   0x8   :  { %18 = vsyncpa [#allocation9], 0 }
   0x9   :  { %19 = vsyncpa [#allocation12], 0 }
   0xa   :  { %20 = vsyncpa [#allocation4], 0 }
   0xb   :  { %22 = vsyncpa [#allocation4 + $0x1], 0  ;;  %s3241_s24 = smov 0   ;;  %s3243_s25 = smov 0  }
   0xc   :  { %s3245_s26 = smov 0   ;;  %s3247_s27 = smov 0  }
   0xd LB: > { %3760 = sst [smem:[#allocation20_spill]] %s3182_s27  ;;  %s3262_s28 = sadd.s32 4294967295, %s3182_s27   ;;  %s3182_s27 = sphi %s3247_s27, %s3789_s27   ;;  %s3178_s26 = sphi %s3245_s26, %s3793_s26   ;;  %s3174_s25 = sphi %s3243_s25, %s3792_s25   ;;  %s3170_s24 = sphi %s3241_s24, %s3791_s24  }
   0xe   : > { %s2513_s29 = sadd.s32 4294967294, %s3182_s27   ;;  %p48_p0 = scmp.ne.s32.totalorder %s3174_s25, %s3170_s24 }
   0xf   : > { %p3749_p1 = scmp.eq.s32.totalorder %s3262_s28, 0  ;;  %p208_p2 = scmp.eq.s32.totalorder %s3262_s28, 1 }
  0x10   : > { %p214_p3 = scmp.eq.s32.totalorder %s2513_s29, 1  ;;  %p2514_p5 = scmp.ge.s32.totalorder %s3182_s27, 1 }
  0x11   : > { %p3271_p4 = por %p3749_p1, %p48_p0  ;;  %p221_p7 = scmp.lt.s32.totalorder %s3182_s27, 3 }
  0x12   : > { %p3276_p6 = por %p214_p3, %p48_p0  ;;  %s3184_s10 = smov [#allocation8]  }
  0x13   : > { %s3761_s30 = scalar_select %p3271_p4, 1, 0 }
  0x14   : > { %s3762_s8 = scalar_select %p3276_p6, 1, 0 }
  0x15   : > { %p3281_p8 = pnand %p2514_p5, %p221_p7  ;;  %s233_s11 = sshll.u32 %s3184_s10, 4  ;;  %s234_s11 = int_to_ptr.vmem [resolvable:$true] %s233_s11 }
  0x16   : > { %s3185_s13 = smov [#allocation11]   ;;  %s2929_s15 = scalar_lea.vmem %s234_s11, 512 }
  0x17   : > { %s3763_s9 = scalar_select %p3281_p8, 1, 0 }
  0x18   : > { %p2804_p9 = pneg %p3281_p8  ;;  %s259_s14 = sshll.u32 %s3185_s13, 4  ;;  %s260_s14 = int_to_ptr.vmem [resolvable:$true] %s259_s14 }
  0x19   : > { %p2930_p13 = scmp.ne.s32.totalorder %s234_s11, %s2929_s15  ;;  %p2937_p5 = scmp.lt.s32.totalorder %s234_s11, %s234_s11 }
  0x1a   : > { %p3290_p11 = pnand %p2804_p9, %p3749_p1  ;;  %p2938_p7 = scmp.lt.s32.totalorder %s2929_s15, %s2929_s15 }
  0x1c   : > { %s3764_s12 = scalar_select %p3290_p11, 1, 0 }
  0x1d   : > { %p3750_p12 = pneg %p3290_p11  ;;  %p2939_p10 = por %p2938_p7, %p2937_p5 }
  0x1f   : > { %p2932_p0 = pnand %p2930_p13, %p3750_p12 }
  0x21   : > { %p2933_p3 = pneg %p2932_p0 }
  0x23   : > { %p2940_p9 = pnand %p2939_p10, %p2933_p3 }
  0x25   : > { %2943 = shalt.err (!%p2940_p9)
}
  0x26   : > { %s3743_s16 = smov 128   ;;  %s3745_s17 = smov 8  }
  0x27   : > { %s3765_s3 = sld [smem:[#allocation24_spill]]  ;;  %s2955_s20 = scalar_lea.vmem %s260_s14, 512 }
  0x28   : > { %p2956_p13 = scmp.ne.s32.totalorder %s260_s14, %s2955_s20  ;;  %p2963_p10 = scmp.lt.s32.totalorder %s260_s14, %s260_s14 }
  0x29   : > { %p2964_p3 = scmp.lt.s32.totalorder %s2955_s20, %s2955_s20 }
  0x2a   : > { %p2958_p0 = pnand %p2956_p13, %p3750_p12 }
  0x2b   : > { %p2965_p7 = por %p2964_p3, %p2963_p10 }
  0x2c   : > { %p2959_p5 = pneg %p2958_p0 }
  0x2d   : > { %2807 = dma.hbm_to_vmem [thread:$0]  (!%p3290_p11), %s3765_s3, 512, %s234_s11, [#allocation9], %s3743_s16, %s3743_s16, %s3745_s17  }
  0x2e   : > { %p2966_p9 = pnand %p2965_p7, %p2959_p5 }
  0x30   : > { %2969 = shalt.err (!%p2966_p9)
}
  0x31   : > { %s3766_s5 = sld [smem:[#allocation25_spill]]  ;;  %s3319_s23 = sadd.s32 1, %s3182_s27  }
  0x32   : > { %3767 = sst [smem:[#allocation21_spill]] %s3319_s23  ;;  %s35_s29 = sadd.s32 1, %s3178_s26 }
  0x33   : > { %s32_s10 = ssub.s32 %s3182_s27, %s3319_s23  ;;  %p42_p13 = scmp.ne.s32.totalorder %s3178_s26, %s3174_s25 }
  0x34   : > { %p33_p0 = scmp.eq.s32.totalorder %s32_s10, 0  ;;  %p43_p5 = scmp.eq.s32.totalorder %s3182_s27, 0 }
  0x35   : > { %p3329_p10 = por %p208_p2, %p42_p13  ;;  %p2835_p3 = scmp.lt.s32.totalorder %s3182_s27, 2 }
  0x36   : > { %s3335_s13 = scalar_select %p33_p0, %s3178_s26, %s35_s29  }
  0x37   : > { %2813 = dma.hbm_to_vmem [thread:$0]  (!%p3290_p11), %s3766_s5, 512, %s260_s14, [#allocation12], %s3743_s16, %s3743_s16, %s3745_s17  }
  0x38   : > { %s3768_s11 = scalar_select %p3329_p10, 1, 0 }
  0x39   : > { %3769 = sst [smem:[#allocation22_spill]] %s3335_s13  ;;  %p44_p7 = por %p43_p5, %p42_p13 }
  0x3a   : > { %s3742_s15 = sand.u32 1, %s3178_s26   ;;  %s3343_s18 = sshll.u32 %s3182_s27, 8 }
  0x3b   : > { %s3340_s14 = sshll.u32 %s3742_s15, 4  ;;  %p3345_p9 = pnand %p2835_p3, %p44_p7 }
  0x3c   : > { %s307_s20 = sand.u32 1, %s3182_s27   ;;  %s3771_s1 = sld [smem:[#allocation23_spill]] }
  0x3d   : > { %s311_s10 = scalar_lea.vmem [#allocation5], %s3340_s14  ;;  %s3188_s16 = smov [#allocation10]  }
  0x3e   : > { %s318_s15 = sshll.u32 %s311_s10, 4  ;;  %s3359_s17 = sshll.u32 %s3188_s16, 4  ;;  %s3357_s15 = int_to_ptr.vmem [resolvable:$true] %s318_s15  ;;  %s247_s17 = int_to_ptr.vmem [resolvable:$true] %s3359_s17 }
  0x3f   : > { %s3361_s3 = scalar_lea.sflag [#allocation6], %s307_s20  ;;  %p3367_p13 = pneg %p3345_p9 }
  0x42   : > { %s3354_s29 = scalar_lea.hbm %s3771_s1, %s3343_s18  ;;  %s2975_s10 = scalar_lea.hbm %s3771_s1, 512 }
  0x43   : > { %s2970_s5 = scalar_lea.hbm %s3354_s29, 256  ;;  %p2976_p3 = scmp.lt.s32.totalorder %s3354_s29, %s3771_s1 }
  0x44   : > { %p2971_p2 = scmp.ne.s32.totalorder %s3354_s29, %s2970_s5  ;;  %p2977_p7 = scmp.lt.s32.totalorder %s2975_s10, %s2970_s5 }
  0x46   : > { %p2973_p0 = pnand %p3367_p13, %p2971_p2  ;;  %p2978_p1 = por %p2977_p7, %p2976_p3 }
  0x48   : > { %p2974_p5 = pneg %p2973_p0 }
  0x4a   : > { %p2979_p12 = pnand %p2978_p1, %p2974_p5 }
  0x4c   : > { %2982 = shalt.err (!%p2979_p12)
}
  0x4d   : > { %s2983_s20 = scalar_lea.vmem %s3357_s15, 256  ;;  %s3189_s27 = smov [#allocation5]  }
  0x4e   : > { %p2984_p6 = scmp.ne.s32.totalorder %s3357_s15, %s2983_s20  ;;  %s2988_s21 = sshll.u32 %s3189_s27, 4  ;;  %s2989_s21 = int_to_ptr.vmem [resolvable:$false] %s2988_s21 }
  0x4f   : > { %s2990_s22 = scalar_lea.vmem %s2989_s21, 512  ;;  %p2991_p10 = scmp.lt.s32.totalorder %s3357_s15, %s2989_s21 }
  0x50   : > { %p2986_p2 = pnand %p2984_p6, %p3367_p13  ;;  %p2992_p4 = scmp.lt.s32.totalorder %s2990_s22, %s2983_s20 }
  0x52   : > { %p2987_p0 = pneg %p2986_p2  ;;  %p2993_p8 = por %p2992_p4, %p2991_p10 }
  0x54   : > { %p2994_p11 = pnand %p2993_p8, %p2987_p0 }
  0x56   : > { %2997 = shalt.err (!%p2994_p11)
}
  0x57   : > { %s3773_s5 = smov 8   ;;  %s3774_s23 = smov 128  }
  0x58   : > { %2823 = dma.hbm_to_vmem [thread:$0]  (!%p3345_p9), %s3354_s29, 256, %s3357_s15, %s3361_s3, %s3774_s23, %s3774_s23, %s3773_s5  }
  0x59   : > { %s3009_s27 = scalar_lea.vmem %s247_s17, 512  ;;  %p3775_p6 = scmp.ne.s32.totalorder %s3764_s12, 0 }
  0x5a   : > { %p3010_p1 = scmp.ne.s32.totalorder %s247_s17, %s3009_s27  ;;  %p3017_p8 = scmp.lt.s32.totalorder %s247_s17, %s247_s17 }
  0x5b   : > { %p3776_p12 = pneg %p3775_p6  ;;  %p3018_p11 = scmp.lt.s32.totalorder %s3009_s27, %s3009_s27 }
  0x5d   : > { %p3012_p5 = pnand %p3010_p1, %p3776_p12  ;;  %p3019_p10 = por %p3018_p11, %p3017_p8 }
  0x5f   : > { %p3013_p4 = pneg %p3012_p5 }
  0x61   : > { %p3020_p3 = pnand %p3019_p10, %p3013_p4 }
  0x63   : > { %3023 = shalt.err (!%p3020_p3)
}
  0x64   : > { %2810 = dma.hbm_to_vmem [thread:$0]  (!%p3775_p6), %s3738_s4, 512, %s247_s17, [#allocation9], %s3774_s23, %s3774_s23, %s3773_s5  }
  0x65   : > { %s3190_s15 = smov [#allocation13]   ;;  %p3777_p2 = pmov %p3776_p12 }
  0x66   : > { %s272_s29 = sshll.u32 %s3190_s15, 4  ;;  %s273_s29 = int_to_ptr.vmem [resolvable:$true] %s272_s29 }
  0x67   : > { %s3035_s20 = scalar_lea.vmem %s273_s29, 512  ;;  %p3043_p12 = scmp.lt.s32.totalorder %s273_s29, %s273_s29 }
  0x68   : > { %p3036_p7 = scmp.ne.s32.totalorder %s273_s29, %s3035_s20  ;;  %p3044_p5 = scmp.lt.s32.totalorder %s3035_s20, %s3035_s20 }
  0x6a   : > { %p3038_p0 = pnand %p3036_p7, %p3777_p2  ;;  %p3045_p4 = por %p3044_p5, %p3043_p12 }
  0x6c   : > { %p3039_p1 = pneg %p3038_p0 }
  0x6e   : > { %p3046_p8 = pnand %p3045_p4, %p3039_p1 }
  0x70   : > { %3049 = shalt.err (!%p3046_p8)
}
  0x71   : > { %2816 = dma.hbm_to_vmem [thread:$0]  (!%p3775_p6), %s3740_s6, 512, %s273_s29, [#allocation12], %s3774_s23, %s3774_s23, %s3773_s5  }
  0x72   : > { %s3420_s10 = scalar_lea.hbm %s3734_s0, %s3343_s18  ;;  %s290_s12 = scalar_lea.vmem [#allocation2], %s3340_s14 }
  0x73   : > { %s297_s16 = sshll.u32 %s290_s12, 4  ;;  %s3778_s15 = sand.u32 1, %s3178_s26   ;;  %s3423_s16 = int_to_ptr.vmem [resolvable:$true] %s297_s16 }
  0x74   : > { %s287_s20 = scalar_lea.sflag [#allocation3], %s3778_s15  ;;  %s3050_s17 = scalar_lea.hbm %s3420_s10, 256 }
  0x75   : > { %p3051_p11 = scmp.ne.s32.totalorder %s3420_s10, %s3050_s17  ;;  %s3055_s22 = scalar_lea.hbm %s3734_s0, 512 }
  0x76   : > { %p3056_p6 = scmp.lt.s32.totalorder %s3420_s10, %s3734_s0  ;;  %p3057_p7 = scmp.lt.s32.totalorder %s3055_s22, %s3050_s17 }
  0x77   : > { %p3053_p10 = pnand %p3051_p11, %p3367_p13 }
  0x78   : > { %p3058_p2 = por %p3057_p7, %p3056_p6 }
  0x79   : > { %p3054_p3 = pneg %p3053_p10 }
  0x7b   : > { %p3059_p0 = pnand %p3058_p2, %p3054_p3 }
  0x7d   : > { %3062 = shalt.err (!%p3059_p0)
}
  0x7e   : > { %s3063_s12 = scalar_lea.vmem %s3423_s16, 256  ;;  %s3191_s15 = smov [#allocation2]  }
  0x7f   : > { %p3064_p1 = scmp.ne.s32.totalorder %s3423_s16, %s3063_s12  ;;  %s3068_s29 = sshll.u32 %s3191_s15, 4  ;;  %s3069_s29 = int_to_ptr.vmem [resolvable:$false] %s3068_s29 }
  0x80   : > { %s3070_s21 = scalar_lea.vmem %s3069_s29, 512  ;;  %p3071_p4 = scmp.lt.s32.totalorder %s3423_s16, %s3069_s29 }
  0x81   : > { %p3066_p12 = pnand %p3064_p1, %p3367_p13  ;;  %p3072_p8 = scmp.lt.s32.totalorder %s3070_s21, %s3063_s12 }
  0x83   : > { %p3067_p5 = pneg %p3066_p12  ;;  %p3073_p11 = por %p3072_p8, %p3071_p4 }
  0x85   : > { %p3074_p10 = pnand %p3073_p11, %p3067_p5 }
  0x87   : > { %3077 = shalt.err (!%p3074_p10)
}
  0x88   : > { %2820 = dma.hbm_to_vmem [thread:$0]  (!%p3345_p9), %s3420_s10, 256, %s3423_s16, %s287_s20, %s3774_s23, %s3774_s23, %s3773_s5  }
  0x89   : > { %s3454_s22 = scalar_lea.hbm %s3736_s2, %s3343_s18  ;;  %s332_s27 = scalar_lea.vmem [#allocation7], %s3340_s14 }
  0x8a   : > { %s339_s12 = sshll.u32 %s332_s27, 4  ;;  %s3078_s15 = scalar_lea.hbm %s3454_s22, 256  ;;  %s340_s12 = int_to_ptr.vmem [resolvable:$true] %s339_s12 }
  0x8b   : > { %p3079_p3 = scmp.ne.s32.totalorder %s3454_s22, %s3078_s15  ;;  %s3083_s10 = scalar_lea.hbm %s3736_s2, 512 }
  0x8c   : > { %p3084_p2 = scmp.lt.s32.totalorder %s3454_s22, %s3736_s2  ;;  %p3085_p0 = scmp.lt.s32.totalorder %s3083_s10, %s3078_s15 }
  0x8d   : > { %p3081_p6 = pnand %p3079_p3, %p3367_p13 }
  0x8e   : > { %p3086_p1 = por %p3085_p0, %p3084_p2 }
  0x8f   : > { %p3082_p7 = pneg %p3081_p6 }
  0x91   : > { %p3087_p12 = pnand %p3086_p1, %p3082_p7 }
  0x93   : > { %3090 = shalt.err (!%p3087_p12)
}
  0x94   : > { %s3091_s14 = scalar_lea.vmem %s340_s12, 256  ;;  %s3192_s18 = smov [#allocation7]  }
  0x95   : > { %p3092_p5 = scmp.ne.s32.totalorder %s340_s12, %s3091_s14  ;;  %s3096_s1 = sshll.u32 %s3192_s18, 4  ;;  %s3097_s1 = int_to_ptr.vmem [resolvable:$false] %s3096_s1 }
  0x96   : > { %s3098_s17 = scalar_lea.vmem %s3097_s1, 512  ;;  %p3099_p11 = scmp.lt.s32.totalorder %s340_s12, %s3097_s1 }
  0x97   : > { %p3094_p4 = pnand %p3092_p5, %p3367_p13  ;;  %p3100_p10 = scmp.lt.s32.totalorder %s3098_s17, %s3091_s14 }
  0x99   : > { %p3095_p8 = pneg %p3094_p4  ;;  %p3101_p3 = por %p3100_p10, %p3099_p11 }
  0x9b   : > { %p3102_p6 = pnand %p3101_p3, %p3095_p8 }
  0x9d   : > { %3105 = shalt.err (!%p3102_p6)
}
  0x9e   : > { %2826 = dma.hbm_to_vmem [thread:$0]  (!%p3345_p9), %s3454_s22, 256, %s340_s12, %s3361_s3, %s3774_s23, %s3774_s23, %s3773_s5  }
  0x9f   : > { %p3779_p13 = scmp.ne.s32.totalorder %s3763_s9, 0 }
  0xa0   : > { %s3480_s13 = sand.u32 (!%p3779_p13), 1, %s3174_s25   ;;  %p3780_p7 = scmp.ne.s32.totalorder (!%p3779_p13), %s3761_s30, 0 }
  0xa1   : > { %351 = sbr.rel (%p3779_p13) target bundleno = 3211 (0xc8b), region = 48  ;;  %s3483_s27 = sshll.u32 (!%p3779_p13), %s3480_s13, 4 }
  0xa2   : > { %s354_s15 = scalar_lea.sflag (!%p3779_p13), [#allocation3], %s3480_s13  ;;  %s357_s19 = scalar_lea.vmem (!%p3779_p13), [#allocation2], %s3483_s27 }
  0xa6   : > { %3149 = dma.done.wait (%p3780_p7), %s354_s15, 256  }
  0xa7   : > { %3151 = vsyncadd (%p3780_p7), %s354_s15, 4294967040  ;;  %s362_s3 = sand.u32 1, %s3262_s28   ;;  %s366_s5 = scalar_lea.vmem [#allocation5], %s3483_s27 }
  0xa8   : > { %s363_s9 = scalar_lea.sflag [#allocation6], %s362_s3 }
  0xa9   : > { %3153 = dma.done.wait (%p3780_p7), %s363_s9, 512  }
  0xaa   : > { %3155 = vsyncadd (%p3780_p7), %s363_s9, 4294966784  ;;  %s375_s23 = scalar_lea.vmem [#allocation7], %s3483_s27  ;;  %p3781_p9 = scmp.eq.s32.totalorder %s3262_s28, 0 }
  0xac   : > { %3157 = dma.done.wait (%p3781_p9), [#allocation9], 1024   ;;  %p3782_p2 = pmov %p3781_p9 }
  0xae   : > { %3159 = vsyncadd (%p3782_p2), [#allocation9], 4294966272  ;;  %p3783_p0 = pmov %p3782_p2 }
  0xb0   : > { %3161 = dma.done.wait (%p3783_p0), [#allocation12], 1024   ;;  %p3784_p1 = pmov %p3783_p0 }
  0xb1   : > { %v531_v0 = vld [vmem:[#allocation10 + $0x18] sm:$0xff]  ;;  %v530_v2 = vld [vmem:[#allocation10 + $0x10] sm:$0xff]  ;;  %v529_v4 = vld [vmem:[#allocation10 + $0x8] sm:$0xff]  ;;  %vm446_vm0 = vcmask 261120   ;;  %v3193_v12 = vmov 0.0   ;;  %vm3194_vm1 = vmmov 0  }
  0xb2   : > { %3163 = vsyncadd (%p3784_p1), [#allocation12], 4294966272  ;;  %v445_v1 = vld [vmem:[#allocation8 + $0x18] sm:$0xff]  ;;  %2658 = vmatprep.subr.mxu1 %v531_v0  ;;  %v444_v3 = vld [vmem:[#allocation8 + $0x10] sm:$0xff]  ;;  %vm698_vm2 = vcmask 64512   ;;  %s3195_s30 = smov 120  }
  0xb3   : > { %2647 = vmatprep.subr.mxu0 %v445_v1  ;;  %2659 = vmatpush3.msra.mxu1 %v531_v0  ;;  %v443_v5 = vld [vmem:[#allocation8 + $0x8] sm:$0xff]  ;;  %v528_v6 = vld [vmem:[#allocation10] sm:$0xff]  ;;  %v616_v17 = vld [vmem:[#allocation11 + $0x18] sm:$0xff]  ;;  %s3196_s22 = smov 112   ;;  %s3197_s12 = smov 104  }
  0xb4   : > { %2648 = vmatpush3.msra.mxu0 %v445_v1  ;;  %2660 = vmatprep.subr.mxu1 %v530_v2  ;;  %v438_v7 = vld [vmem:[%s366_s5] sm:$0xff]  ;;  %v439_v9 = vld [vmem:[%s366_s5 + $0x8] sm:$0xff]  ;;  %s431_s29 = scalar_lea.vmem [#allocation14], %s3483_s27  ;;  %s2584_s10 = sshll.u32 %s3262_s28, 8 }
  0xb5   : > { %2649 = vmatprep.subr.mxu0 %v444_v3  ;;  %2661 = vmatpush3.msra.mxu1 %v530_v2  ;;  %v442_v8 = vld [vmem:[#allocation8] sm:$0xff]  ;;  %v437_v11 = vld [vmem:[%s357_s19 + $0x8] sm:$0xff]  ;;  %v615_v18 = vld [vmem:[#allocation11 + $0x10] sm:$0xff]  ;;  %s2359_s21 = sshll.u32 %s431_s29, 4  ;;  %s3689_s14 = scalar_lea.hbm %s3741_s7, %s2584_s10  ;;  %s3684_s21 = int_to_ptr.vmem [resolvable:$true] %s2359_s21 }
  0xb6   : > { %2650 = vmatpush3.msra.mxu0 %v444_v3  ;;  %2662 = vmatprep.subr.mxu1 %v529_v4  ;;  %v436_v10 = vld [vmem:[%s357_s19] sm:$0xff]  ;;  %v614_v20 = vld [vmem:[#allocation11 + $0x8] sm:$0xff]  ;;  %s2346_s18 = scalar_lea.sflag [#allocation4], %s3480_s13  ;;  %s3106_s28 = scalar_lea.vmem %s3684_s21, 256 }
  0xb7   : > { %2651 = vmatprep.subr.mxu0 %v443_v5  ;;  %2663 = vmatpush3.msra.mxu1 %v529_v4  ;;  %v440_v19 = vld [vmem:[%s375_s23] sm:$0xff]  ;;  %v441_v22 = vld [vmem:[%s375_s23 + $0x8] sm:$0xff]  ;;  %p3107_p12 = scmp.ne.s32.totalorder %s3684_s21, %s3106_s28  ;;  %p3785_p5 = scmp.ne.s32.totalorder %s3768_s11, 0 }
  0xb8   : > { %2652 = vmatpush3.msra.mxu0 %v443_v5  ;;  %2664 = vmatprep.subr.mxu1 %v528_v6  ;;  %v613_v21 = vld [vmem:[#allocation11] sm:$0xff]  ;;  %s3198_s1 = smov [#allocation14]  }
  0xb9   : > { %2666 = vmatprep.mubr.msk.f32.mxu1 %vm446_vm0, %v438_v7  ;;  %2665 = vmatpush3.msra.mxu1 %v528_v6  ;;  %p3108_p4 = pnand %p3107_p12, %p3785_p5  ;;  %s3110_s17 = sshll.u32 %s3198_s1, 4  ;;  %s3111_s17 = int_to_ptr.vmem [resolvable:$false] %s3110_s17 }
  0xba   : > { %2653 = vmatprep.subr.mxu0 %v442_v8  ;;  %2667 = vmatmul.mubr.msk.f32.vlgmr.msra.gmra.mxu1 %vm446_vm0, %v439_v9  ;;  %s3112_s27 = scalar_lea.vmem %s3111_s17, 512  ;;  %p3113_p11 = scmp.lt.s32.totalorder %s3684_s21, %s3111_s17 }
  0xbb   : > { %2654 = vmatpush3.msra.mxu0 %v442_v8  ;;  %2655 = vmatprep.mubr.msk.f32.mxu0 %vm446_vm0, %v436_v10  ;;  %v1019_v8 = vld [vmem:[#allocation13] sm:$0xff]  ;;  %p3109_p8 = pneg %p3108_p4  ;;  %p3114_p10 = scmp.lt.s32.totalorder %s3112_s27, %s3106_s28 }
  0xbc   : > { %2656 = vmatmul.mubr.msk.f32.vlgmr.msra.gmra.mxu0 %vm446_vm0, %v437_v11  ;;  %2680 = vmatprep.subr.mxu1 %v3193_v12 }
  0xbd   : > { %2682 = vmatprep.mubr.msk.f32.mxu1 %vm3194_vm1, %v3193_v12  ;;  %2669 = vmatprep.subr.mxu0 %v616_v17  ;;  %p3115_p3 = por %p3114_p10, %p3113_p11 }
  0xbe   : > { %2670 = vmatpush3.msra.mxu0 %v616_v17  ;;  %2677 = vmatprep.mubr.msk.f32.mxu0 %vm446_vm0, %v440_v19 }
  0xbf   : > { %2671 = vmatprep.subr.mxu0 %v615_v18  ;;  %p3116_p6 = pnand %p3115_p3, %p3109_p8 }
  0xc0   : > { %2672 = vmatpush3.msra.mxu0 %v615_v18 }
  0xc1   : > { %2673 = vmatprep.subr.mxu0 %v614_v20 }
  0xc2   : > { %2674 = vmatpush3.msra.mxu0 %v614_v20 }
  0xc3   : > { %2675 = vmatprep.subr.mxu0 %v613_v21 }
  0xc4   : > { %2676 = vmatpush3.msra.mxu0 %v613_v21 }
  0xc5   : > { %2678 = vmatmul.mubr.msk.f32.vlgmr.msra.gmra.mxu0 %vm446_vm0, %v441_v22  ;;  %2690 = vmatprep.subr.mxu0 %v3193_v12 }
  0xc6   : > { %2692 = vmatprep.mubr.msk.f32.mxu0 %vm3194_vm1, %v3193_v12 }
 0x17a   : > { %v3517_v13 = vpop.f32.mrf.mxu1 }
 0x17b   : > { %1100 = vrot.lane.b32.xlu1 %v3517_v13, %s3195_s30 }
 0x17c   : > { %v3521_v14 = vpop.f32.mrf.mxu0  ;;  %v3523_v15 = vpop.f32.mrf.mxu1 }
 0x17d   : > { %2681 = vmatpush3.xpose.msk.msra.mxu1 %vm698_vm2, %v3523_v15 }
 0x17e   : > { %v3527_v16 = vpop.f32.mrf.mxu0  ;;  %2685 = vmatprep.subr.mxu1 %v3193_v12 }
 0x17f   : > { %1020 = vrot.lane.b32.xlu1 %v3527_v16, %s3195_s30 }
 0x180   : > { %2683 = vmatmul.mubr.msk.f32.vlgmr.msra.gmra.mxu1 %vm698_vm2, %v3527_v16 }
 0x181   : > { %2686 = vmatpush3.xpose.msk.msra.mxu1 %vm698_vm2, %v3517_v13  ;;  %2687 = vmatprep.mubr.msk.f32.mxu1 %vm3194_vm1, %v3193_v12 }
 0x182   : > { %2695 = vmatprep.subr.mxu1 %v3193_v12 }
 0x184   : > { %2688 = vmatmul.mubr.msk.f32.vlgmr.msra.gmra.mxu1 %vm698_vm2, %v3521_v14 }
 0x185   : > { %2697 = vmatprep.mubr.msk.f32.mxu1 %vm3194_vm1, %v3193_v12  ;;  %v3558_v39 = vpop.f32.mrf.mxu0 }
 0x186   : > { %2696 = vmatpush3.msra.mxu1 %v3558_v39 }
 0x187   : > { %v3561_v40 = vpop.f32.mrf.mxu0  ;;  %2705 = vmatprep.subr.mxu1 %v3193_v12 }
 0x188   : > { %2691 = vmatpush3.msra.mxu0 %v3561_v40 }
 0x189   : > { %2700 = vmatprep.subr.mxu0 %v3193_v12 }
 0x1ed   : > { %v1101_v41 = vpop.permute.xlu1 %1100 }
 0x1f1   : > { %v1021_v42 = vpop.permute.xlu1 %1020 }
 0x240   : > { %v771_v23 = vpop.f32.mrf.mxu1 }
 0x241   : > { %v851_v24 = vsel %vm698_vm2, %v771_v23, -inf }
 0x242   : > { %852 = vmax.xlane.f32.xlu0 %v851_v24  ;;  %v2684_v25 = vpop.f32.mrf.mxu1  ;;  %v1352_v24 = vld [vmem:[#allocation13 + $0x8] sm:$0xff] }
 0x244   : > { %v847_v26 = vpop.f32.mrf.mxu1 }
 0x245   : > { %v854_v27 = vsel %vm698_vm2, %v847_v26, -inf }
 0x246   : > { %855 = vmax.xlane.f32.xlu0 %v854_v27  ;;  %v2689_v28 = vpop.f32.mrf.mxu1 }
 0x25c   : > { %1022 = vrot.lane.b32.xlu0 %v3523_v15, %s3195_s30 }
 0x2cb   : > { %v853_v29 = vpop.xlane.xlu0 %852 }
 0x2cc   : > { %v857_v30 = vsub.f32 %v771_v23, %v853_v29 }
 0x2ce   : > { %v859_v31 = vmul.f32 1.442695, %v857_v30 }
 0x2cf   : > { %v856_v32 = vpop.xlane.xlu0 %855 }
 0x2d0   : > { %2886 = vpow2.f32 %v859_v31  ;;  %v858_v33 = vsub.f32 %v847_v26, %v856_v32 }
 0x2d2   : > { %v861_v34 = vmul.f32 1.442695, %v858_v33 }
 0x2d3   : > { %v1023_v47 = vpop.permute.xlu0 %1022 }
 0x2d4   : > { %2888 = vpow2.f32 %v861_v34 }
 0x2dd   : > { %v2887_v35 = vpop.eup %2886 }
 0x2de   : > { %v863_v36 = vsel %vm698_vm2, %v2887_v35, 0.0 }
 0x2df   : > { %864 = vadd.xlane.f32.xlu1 %v863_v36 }
 0x2e1   : > { %v2889_v37 = vpop.eup %2888 }
 0x2e2   : > { %v866_v38 = vsel %vm698_vm2, %v2889_v37, 0.0 }
 0x2e3   : > { %867 = vadd.xlane.f32.xlu1 %v866_v38 }
 0x2f4   : > { %1098 = vrot.lane.b32.xlu1 %v3521_v14, %s3195_s30 }
 0x368   : > { %v865_v43 = vpop.xlane.xlu1 %864 }
 0x369   : > { %2890 = vrcp.f32 %v865_v43 }
 0x36c   : > { %v868_v44 = vpop.xlane.xlu1 %867 }
 0x36d   : > { %2892 = vrcp.f32 %v868_v44 }
 0x370   : > { %v1099_v50 = vpop.permute.xlu1 %1098 }
 0x376   : > { %v2891_v45 = vpop.eup %2890 }
 0x377   : > { %v871_v46 = vmul.f32 %v2891_v45, %v2887_v35 }
 0x379   : > { %2693 = vmatmul.mubr.msk.f32.vlgmr.msra.gmra.mxu0 %vm698_vm2, %v871_v46 }
 0x37a   : > { %v2893_v48 = vpop.eup %2892  ;;  %2701 = vmatpush3.xpose.msk.msra.mxu0 %vm698_vm2, %v1023_v47  ;;  %2702 = vmatprep.mubr.msk.f32.mxu0 %vm3194_vm1, %v3193_v12 }
 0x37b   : > { %v872_v49 = vmul.f32 %v2893_v48, %v2889_v37  ;;  %2710 = vmatprep.subr.mxu0 %v3193_v12 }
 0x37d   : > { %2698 = vmatmul.mubr.msk.f32.vlgmr.msra.gmra.mxu1 %vm698_vm2, %v872_v49  ;;  %2703 = vmatmul.mubr.msk.f32.vlgmr.msra.gmra.mxu0 %vm698_vm2, %v1021_v42 }
 0x37e   : > { %2706 = vmatpush3.xpose.msk.msra.mxu1 %vm698_vm2, %v1101_v41  ;;  %2707 = vmatprep.mubr.msk.f32.mxu1 %vm3194_vm1, %v3193_v12 }
 0x37f   : > { %2715 = vmatprep.subr.mxu1 %v3193_v12  ;;  %2712 = vmatprep.mubr.msk.f32.mxu0 %vm3194_vm1, %v3193_v12 }
 0x381   : > { %2708 = vmatmul.mubr.msk.f32.vlgmr.msra.gmra.mxu1 %vm698_vm2, %v1099_v50 }
 0x382   : > { %2717 = vmatprep.mubr.msk.f32.mxu1 %vm3194_vm1, %v3193_v12 }
 0x439   : > { %v942_v51 = vpop.f32.mrf.mxu0 }
 0x43b   : > { %v2694_v52 = vpop.f32.mrf.mxu0 }
 0x43d   : > { %v1015_v53 = vpop.f32.mrf.mxu1  ;;  %v1094_v54 = vpop.f32.mrf.mxu0 }
 0x43e   : > { %v1176_v55 = vsel %vm698_vm2, %v1094_v54, -inf }
 0x43f   : > { %v2699_v56 = vpop.f32.mrf.mxu1  ;;  %1177 = vmax.xlane.f32.xlu0 %v1176_v55  ;;  %v2704_v57 = vpop.f32.mrf.mxu0 }
 0x441   : > { %v1172_v58 = vpop.f32.mrf.mxu1 }
 0x442   : > { %v1179_v59 = vsel %vm698_vm2, %v1172_v58, -inf }
 0x443   : > { %1180 = vmax.xlane.f32.xlu1 %v1179_v59  ;;  %v2709_v60 = vpop.f32.mrf.mxu1 }
 0x454   : > { %1276 = vrot.lane.b32.xlu1 %v3558_v39, %s3195_s30 }
 0x458   : > { %1517 = vrot.lane.b32.xlu1 %v3523_v15, %s3196_s22 }
 0x45c   : > { %1595 = vrot.lane.b32.xlu1 %v3517_v13, %s3196_s22 }
 0x460   : > { %1593 = vrot.lane.b32.xlu1 %v3521_v14, %s3196_s22 }
 0x4c8   : > { %v1178_v61 = vpop.xlane.xlu0 %1177 }
 0x4c9   : > { %v1182_v62 = vsub.f32 %v1094_v54, %v1178_v61  ;;  %v1845_v61 = vld [vmem:[#allocation13 + $0x10] sm:$0xff] }
 0x4cb   : > { %v1184_v63 = vmul.f32 1.442695, %v1182_v62 }
 0x4cc   : > { %v1181_v0 = vpop.xlane.xlu1 %1180 }
 0x4cd   : > { %2894 = vpow2.f32 %v1184_v63  ;;  %v1183_v1 = vsub.f32 %v1172_v58, %v1181_v0 }
 0x4cf   : > { %v1186_v2 = vmul.f32 1.442695, %v1183_v1 }
 0x4d0   : > { %v1277_v3 = vpop.permute.xlu1 %1276 }
 0x4d1   : > { %2896 = vpow2.f32 %v1186_v2  ;;  %2716 = vmatpush3.msra.mxu1 %v1277_v3 }
 0x4d2   : > { %2725 = vmatprep.subr.mxu1 %v1019_v8 }
 0x4d4   : > { %v1518_v19 = vpop.permute.xlu1 %1517 }
 0x4d8   : > { %v1596_v22 = vpop.permute.xlu1 %1595 }
 0x4da   : > { %v2895_v4 = vpop.eup %2894 }
 0x4db   : > { %v1188_v5 = vsel %vm698_vm2, %v2895_v4, 0.0 }
 0x4dc   : > { %1189 = vadd.xlane.f32.xlu0 %v1188_v5  ;;  %v1594_v23 = vpop.permute.xlu1 %1593 }
 0x4de   : > { %v2897_v6 = vpop.eup %2896 }
 0x4df   : > { %v1191_v7 = vsel %vm698_vm2, %v2897_v6, 0.0 }
 0x4e0   : > { %1192 = vadd.xlane.f32.xlu0 %v1191_v7 }
 0x4f6   : > { %1199 = vrot.lane.b32.xlu0 %v3561_v40, %s3195_s30 }
 0x4fa   : > { %1515 = vrot.lane.b32.xlu0 %v3527_v16, %s3196_s22 }
 0x565   : > { %v1190_v9 = vpop.xlane.xlu0 %1189 }
 0x566   : > { %2898 = vrcp.f32 %v1190_v9 }
 0x569   : > { %v1193_v10 = vpop.xlane.xlu0 %1192 }
 0x56a   : > { %2900 = vrcp.f32 %v1193_v10 }
 0x56d   : > { %v1200_v11 = vpop.permute.xlu0 %1199 }
 0x56e   : > { %2711 = vmatpush3.msra.mxu0 %v1200_v11 }
 0x56f   : > { %2720 = vmatprep.subr.mxu0 %v1352_v24 }
 0x571   : > { %v1516_v29 = vpop.permute.xlu0 %1515 }
 0x573   : > { %v2899_v17 = vpop.eup %2898 }
 0x574   : > { %v1196_v18 = vmul.f32 %v2899_v17, %v2895_v4 }
 0x576   : > { %2713 = vmatmul.mubr.msk.f32.vlgmr.msra.gmra.mxu0 %vm698_vm2, %v1196_v18 }
 0x577   : > { %v2901_v20 = vpop.eup %2900  ;;  %2721 = vmatpush3.msra.mxu0 %v1352_v24 }
 0x578   : > { %v1197_v21 = vmul.f32 %v2901_v20, %v2897_v6  ;;  %2730 = vmatprep.subr.mxu0 %v3193_v12 }
 0x57a   : > { %2718 = vmatmul.mubr.msk.f32.vlgmr.msra.gmra.mxu1 %vm698_vm2, %v1197_v21 }
 0x57b   : > { %2727 = vmatprep.mubr.msk.f32.mxu1 %vm698_vm2, %v942_v51  ;;  %2726 = vmatpush3.msra.mxu1 %v1019_v8 }
 0x57c   : > { %2735 = vmatprep.subr.mxu1 %v3193_v12 }
 0x57e   : > { %2728 = vmatmul.mubr.msk.f32.vlgmr.msra.gmra.mxu1 %vm698_vm2, %v1015_v53 }
 0x57f   : > { %2736 = vmatpush3.xpose.msk.msra.mxu1 %vm698_vm2, %v1596_v22  ;;  %2737 = vmatprep.mubr.msk.f32.mxu1 %vm3194_vm1, %v3193_v12 }
 0x580   : > { %2745 = vmatprep.subr.mxu1 %v3193_v12 }
 0x582   : > { %2738 = vmatmul.mubr.msk.f32.vlgmr.msra.gmra.mxu1 %vm698_vm2, %v1594_v23 }
 0x583   : > { %2747 = vmatprep.mubr.msk.f32.mxu1 %vm3194_vm1, %v3193_v12 }
 0x636   : > { %v1271_v25 = vpop.f32.mrf.mxu0 }
 0x637   : > { %2722 = vmatprep.mubr.msk.f32.mxu0 %vm698_vm2, %v1271_v25 }
 0x638   : > { %v2714_v26 = vpop.f32.mrf.mxu0 }
 0x63a   : > { %v1348_v27 = vpop.f32.mrf.mxu1 }
 0x63b   : > { %2723 = vmatmul.mubr.msk.f32.vlgmr.msra.gmra.mxu0 %vm698_vm2, %v1348_v27 }
 0x63c   : > { %2731 = vmatpush3.xpose.msk.msra.mxu0 %vm698_vm2, %v1518_v19  ;;  %v2719_v28 = vpop.f32.mrf.mxu1  ;;  %2732 = vmatprep.mubr.msk.f32.mxu0 %vm3194_vm1, %v3193_v12 }
 0x63d   : > { %2740 = vmatprep.subr.mxu0 %v3193_v12 }
 0x63e   : > { %v3619_v30 = vpop.f32.mrf.mxu1 }
 0x63f   : > { %2733 = vmatmul.mubr.msk.f32.vlgmr.msra.gmra.mxu0 %vm698_vm2, %v1516_v29 }
 0x640   : > { %v3622_v31 = vpop.f32.mrf.mxu1  ;;  %2742 = vmatprep.mubr.msk.f32.mxu0 %vm3194_vm1, %v3193_v12 }
 0x642   : > { %v1667_v32 = vpop.f32.mrf.mxu1 }
 0x643   : > { %v1674_v33 = vsel %vm698_vm2, %v1667_v32, -inf }
 0x644   : > { %1675 = vmax.xlane.f32.xlu1 %v1674_v33  ;;  %v2739_v34 = vpop.f32.mrf.mxu1 }
 0x645   : > { %v2259_v34 = vld [vmem:[#allocation13 + $0x18] sm:$0xff] }
 0x655   : > { %1769 = vrot.lane.b32.xlu1 %v3558_v39, %s3196_s22 }
 0x659   : > { %1931 = vrot.lane.b32.xlu1 %v3523_v15, %s3197_s12 }
 0x65d   : > { %2009 = vrot.lane.b32.xlu1 %v3517_v13, %s3197_s12 }
 0x661   : > { %2007 = vrot.lane.b32.xlu1 %v3521_v14, %s3197_s12 }
 0x6cd   : > { %v1676_v35 = vpop.xlane.xlu1 %1675 }
 0x6ce   : > { %v1678_v37 = vsub.f32 %v1667_v32, %v1676_v35 }
 0x6d0   : > { %v1681_v38 = vmul.f32 1.442695, %v1678_v37 }
 0x6d1   : > { %v1770_v36 = vpop.permute.xlu1 %1769 }
 0x6d2   : > { %2746 = vmatpush3.msra.mxu1 %v1770_v36  ;;  %2902 = vpow2.f32 %v1681_v38 }
 0x6d3   : > { %2755 = vmatprep.subr.mxu1 %v3193_v12 }
 0x6d5   : > { %v1932_v53 = vpop.permute.xlu1 %1931 }
 0x6d9   : > { %v2010_v0 = vpop.permute.xlu1 %2009 }
 0x6dd   : > { %v2008_v3 = vpop.permute.xlu1 %2007 }
 0x6df   : > { %v2903_v44 = vpop.eup %2902 }
 0x6e0   : > { %v1686_v14 = vsel %vm698_vm2, %v2903_v44, 0.0 }
 0x6fb   : > { %v3636_v41 = vpop.f32.mrf.mxu0 }
 0x6fc   : > { %v1512_v9 = vadd.f32 %v3619_v30, %v3636_v41 }
 0x6fd   : > { %v3638_v42 = vpop.f32.mrf.mxu0 }
 0x6fe   : > { %v1507_v11 = vadd.f32 %v3622_v31, %v3638_v42 }
 0x6ff   : > { %v1589_v43 = vpop.f32.mrf.mxu0 }
 0x700   : > { %v1671_v15 = vsel %vm698_vm2, %v1589_v43, -inf }
 0x701   : > { %1672 = vmax.xlane.f32.xlu0 %v1671_v15  ;;  %v2734_v13 = vpop.f32.mrf.mxu0 }
 0x705   : > { %1687 = vadd.xlane.f32.xlu0 %v1686_v14 }
 0x78a   : > { %v1673_v45 = vpop.xlane.xlu0 %1672 }
 0x78b   : > { %v1677_v46 = vsub.f32 %v1589_v43, %v1673_v45 }
 0x78d   : > { %v1679_v47 = vmul.f32 1.442695, %v1677_v46 }
 0x78e   : > { %v1688_v48 = vpop.xlane.xlu0 %1687 }
 0x78f   : > { %2904 = vpow2.f32 %v1679_v47 }
 0x790   : > { %2906 = vrcp.f32 %v1688_v48 }
 0x79c   : > { %v2905_v49 = vpop.eup %2904 }
 0x79d   : > { %v2907_v50 = vpop.eup %2906  ;;  %v1683_v51 = vsel %vm698_vm2, %v2905_v49, 0.0 }
 0x79e   : > { %1684 = vadd.xlane.f32.xlu0 %v1683_v51  ;;  %v1692_v52 = vmul.f32 %v2907_v50, %v2903_v44 }
 0x7a0   : > { %2748 = vmatmul.mubr.msk.f32.vlgmr.msra.gmra.mxu1 %vm698_vm2, %v1692_v52 }
 0x7a1   : > { %2756 = vmatpush3.xpose.msk.msra.mxu1 %vm698_vm2, %v1932_v53  ;;  %2757 = vmatprep.mubr.msk.f32.mxu1 %vm3194_vm1, %v3193_v12 }
 0x7a2   : > { %2765 = vmatprep.subr.mxu1 %v3193_v12 }
 0x7b4   : > { %1693 = vrot.lane.b32.xlu0 %v3561_v40, %s3196_s22 }
 0x7b8   : > { %1929 = vrot.lane.b32.xlu0 %v3527_v16, %s3197_s12 }
 0x827   : > { %v1685_v54 = vpop.xlane.xlu0 %1684 }
 0x828   : > { %2908 = vrcp.f32 %v1685_v54 }
 0x82b   : > { %v1694_v55 = vpop.permute.xlu0 %1693 }
 0x82c   : > { %2741 = vmatpush3.msra.mxu0 %v1694_v55 }
 0x82d   : > { %2750 = vmatprep.subr.mxu0 %v1845_v61 }
 0x82f   : > { %v1930_v56 = vpop.permute.xlu0 %1929 }
 0x830   : > { %2758 = vmatmul.mubr.msk.f32.vlgmr.msra.gmra.mxu1 %vm698_vm2, %v1930_v56 }
 0x831   : > { %2767 = vmatprep.mubr.msk.f32.mxu1 %vm3194_vm1, %v3193_v12 }
 0x835   : > { %v2909_v57 = vpop.eup %2908 }
 0x836   : > { %v1691_v58 = vmul.f32 %v2909_v57, %v2905_v49 }
 0x838   : > { %2743 = vmatmul.mubr.msk.f32.vlgmr.msra.gmra.mxu0 %vm698_vm2, %v1691_v58 }
 0x839   : > { %2751 = vmatpush3.msra.mxu0 %v1845_v61 }
 0x83a   : > { %2760 = vmatprep.subr.mxu0 %v3193_v12 }
 0x860   : > { %v1841_v59 = vpop.f32.mrf.mxu1 }
 0x862   : > { %v2749_v60 = vpop.f32.mrf.mxu1 }
 0x8f0   : > { %v2003_v16 = vpop.f32.mrf.mxu1 }
 0x8f1   : > { %v2085_v62 = vsel %vm698_vm2, %v2003_v16, -inf }
 0x8f2   : > { %2086 = vmax.xlane.f32.xlu0 %v2085_v62  ;;  %v2759_v63 = vpop.f32.mrf.mxu1 }
 0x8f8   : > { %v1765_v1 = vpop.f32.mrf.mxu0 }
 0x8f9   : > { %2752 = vmatprep.mubr.msk.f32.mxu0 %vm698_vm2, %v1765_v1 }
 0x8fa   : > { %v2744_v2 = vpop.f32.mrf.mxu0  ;;  %2753 = vmatmul.mubr.msk.f32.vlgmr.msra.gmra.mxu0 %vm698_vm2, %v1841_v59 }
 0x8fb   : > { %2761 = vmatpush3.xpose.msk.msra.mxu0 %vm698_vm2, %v2010_v0  ;;  %2762 = vmatprep.mubr.msk.f32.mxu0 %vm3194_vm1, %v3193_v12 }
 0x8fc   : > { %2770 = vmatprep.subr.mxu0 %v3193_v12 }
 0x8fe   : > { %2763 = vmatmul.mubr.msk.f32.vlgmr.msra.gmra.mxu0 %vm698_vm2, %v2008_v3 }
 0x8ff   : > { %2772 = vmatprep.mubr.msk.f32.mxu0 %vm3194_vm1, %v3193_v12 }
 0x97b   : > { %v2087_v4 = vpop.xlane.xlu0 %2086 }
 0x97c   : > { %v2091_v5 = vsub.f32 %v2003_v16, %v2087_v4 }
 0x97e   : > { %v2093_v6 = vmul.f32 1.442695, %v2091_v5 }
 0x980   : > { %2910 = vpow2.f32 %v2093_v6 }
 0x98d   : > { %v2911_v7 = vpop.eup %2910 }
 0x98e   : > { %v2097_v8 = vsel %vm698_vm2, %v2911_v7, 0.0 }
 0x98f   : > { %2098 = vadd.xlane.f32.xlu0 %v2097_v8 }
 0x9ba   : > { %v2754_v10 = vpop.f32.mrf.mxu0 }
 0x9bb   : > { %v1928_v17 = vadd.f32 %v2754_v10, %v1512_v9 }
 0x9bc   : > { %v1918_v18 = vpop.f32.mrf.mxu0 }
 0x9bd   : > { %v1927_v19 = vadd.f32 %v1918_v18, %v1507_v11 }
 0x9be   : > { %v2081_v20 = vpop.f32.mrf.mxu0 }
 0x9bf   : > { %v2088_v12 = vsel %vm698_vm2, %v2081_v20, -inf }
 0x9c0   : > { %2089 = vmax.xlane.f32.xlu1 %v2088_v12  ;;  %v2764_v21 = vpop.f32.mrf.mxu0 }
 0x9d1   : > { %2183 = vrot.lane.b32.xlu1 %v3558_v39, %s3197_s12 }
 0xa18   : > { %v2099_v28 = vpop.xlane.xlu0 %2098 }
 0xa49   : > { %v2090_v22 = vpop.xlane.xlu1 %2089 }
 0xa4a   : > { %v2092_v23 = vsub.f32 %v2081_v20, %v2090_v22 }
 0xa4c   : > { %v2095_v24 = vmul.f32 1.442695, %v2092_v23 }
 0xa4d   : > { %v2184_v25 = vpop.permute.xlu1 %2183 }
 0xa4e   : > { %2912 = vpow2.f32 %v2095_v24  ;;  %2771 = vmatpush3.msra.mxu0 %v2184_v25 }
 0xa4f   : > { %2914 = vrcp.f32 %v2099_v28 }
 0xa5b   : > { %v2913_v26 = vpop.eup %2912 }
 0xa5c   : > { %v2100_v27 = vsel %vm698_vm2, %v2913_v26, 0.0  ;;  %v2915_v30 = vpop.eup %2914 }
 0xa5d   : > { %2101 = vadd.xlane.f32.xlu0 %v2100_v27  ;;  %v2105_v39 = vmul.f32 %v2915_v30, %v2911_v7 }
 0xa73   : > { %2107 = vrot.lane.b32.xlu0 %v3561_v40, %s3197_s12 }
 0xae6   : > { %v2102_v29 = vpop.xlane.xlu0 %2101 }
 0xae7   : > { %2916 = vrcp.f32 %v2102_v29 }
 0xaea   : > { %v2108_v31 = vpop.permute.xlu0 %2107 }
 0xaeb   : > { %2766 = vmatpush3.msra.mxu1 %v2108_v31 }
 0xaec   : > { %2768 = vmatmul.mubr.msk.f32.vlgmr.msra.gmra.mxu1 %vm698_vm2, %v2105_v39  ;;  %2775 = vmatprep.subr.mxu1 %v2259_v34 }
 0xaed   : > { %2776 = vmatpush3.msra.mxu1 %v2259_v34 }
 0xaf4   : > { %v2917_v32 = vpop.eup %2916 }
 0xaf5   : > { %v2106_v33 = vmul.f32 %v2917_v32, %v2913_v26 }
 0xaf7   : > { %2773 = vmatmul.mubr.msk.f32.vlgmr.msra.gmra.mxu0 %vm698_vm2, %v2106_v33 }
 0xbac   : > { %v2179_v40 = vpop.f32.mrf.mxu1 }
 0xbad   : > { %2777 = vmatprep.mubr.msk.f32.mxu1 %vm698_vm2, %v2179_v40 }
 0xbae   : > { %v2769_v35 = vpop.f32.mrf.mxu1 }
 0xbb7   : > { %v2255_v36 = vpop.f32.mrf.mxu0 }
 0xbb8   : > { %2778 = vmatmul.mubr.msk.f32.vlgmr.msra.gmra.mxu1 %vm698_vm2, %v2255_v36 }
 0xbb9   : > { %v2774_v37 = vpop.f32.mrf.mxu0 }
 0xc78   : > { %v2779_v38 = vpop.f32.mrf.mxu1 }
 0xc79   : > { %v2342_v41 = vadd.f32 %v2779_v38, %v1928_v17 }
 0xc7a   : > { %v2332_v42 = vpop.f32.mrf.mxu1 }
 0xc7b   : > { %2344 = vst.msk [vmem:[%s431_s29 + $0x8] sm:$0xff] %vm446_vm0, %v2342_v41  ;;  %v2341_v43 = vadd.f32 %v2332_v42, %v1927_v19 }
 0xc7d   : > { %2343 = vst.msk [vmem:[%s431_s29] sm:$0xff] %vm446_vm0, %v2341_v43 }
 0xc7e   : > { %3119 = shalt.err (!%p3116_p6)
}
 0xc7f   : > { %s3120_s15 = scalar_lea.hbm %s3689_s14, 256  ;;  %s3124_s9 = scalar_lea.hbm %s3741_s7, 512 }
 0xc80   : > { %p3121_p13 = scmp.ne.s32.totalorder %s3689_s14, %s3120_s15  ;;  %p3125_p2 = scmp.lt.s32.totalorder %s3689_s14, %s3741_s7 }
 0xc81   : > { %p3126_p0 = scmp.lt.s32.totalorder %s3124_s9, %s3120_s15 }
 0xc82   : > { %p3122_p7 = pnand %p3121_p13, %p3785_p5 }
 0xc83   : > { %p3127_p1 = por %p3126_p0, %p3125_p2 }
 0xc84   : > { %p3123_p9 = pneg %p3122_p7 }
 0xc86   : > { %p3128_p12 = pnand %p3127_p1, %p3123_p9 }
 0xc88   : > { %3131 = shalt.err (!%p3128_p12)
}
 0xc89   : > { %s3199_s30 = smov 128   ;;  %s3200_s22 = smov 8  }
 0xc8a   : > { %2802 = dma.vmem_to_hbm [thread:$0]  (%p3785_p5), %s3684_s21, 256, %s3689_s14, %s2346_s18, %s3199_s30, %s3199_s30, %s3200_s22  }
 0xc8b PF: > { %s3786_s12 = sld [smem:[#allocation20_spill]]  ;;  %s2374_s29 = sand.u32 1, %s3170_s24  }
 0xc8c   : > { %p3787_p4 = scmp.ne.s32.totalorder %s3762_s8, 0  ;;  %s2375_s10 = scalar_lea.sflag [#allocation4], %s2374_s29 }
 0xc91   : > { %p3788_p8 = scmp.ge.s32.totalorder %s3786_s12, 2 }
 0xc93   : > { %p2828_p11 = pnand %p3788_p8, %p3787_p4 }
 0xc95   : > { %p2829_p10 = pneg %p2828_p11 }
 0xc97   : > { %3165 = dma.done.wait (%p2829_p10), %s2375_s10, 256  }
 0xc98   : > { %3167 = vsyncadd (%p2829_p10), %s2375_s10, 4294967040  ;;  %s3789_s27 = sld [smem:[#allocation21_spill]]  ;;  %s3791_s24 = smov %s3174_s25 }
 0xc99   : > { %s3790_s16 = sld [smem:[#allocation22_spill]]  ;;  %s3792_s25 = smov %s3178_s26 }
 0xc9e   : > { %p25_p3 = scmp.ge.s32.totalorder %s3789_s27, 4  }
 0xc9f   : > { %s3793_s26 = smov %s3790_s16 }
 0xca0   :  { %27 = sbr.rel (!%p25_p3) target bundleno = 13 (0xd), region = 133 }
 0xca5   :  { %2380 = vsyncpa [#allocation3], 1 }
 0xca6   :  { %2382 = vsyncpa [#allocation3 + $0x1], 1 }
 0xca7   :  { %2383 = vsyncpa [#allocation6], 1 }
 0xca8   :  { %2385 = vsyncpa [#allocation6 + $0x1], 1 }
 0xca9   :  { %2386 = vsyncpa [#allocation9], 1 }
 0xcaa   :  { %2387 = vsyncpa [#allocation12], 1 }
 0xcab   :  { %2388 = vsyncpa [#allocation4], 1 }
 0xcac   :  { %2390 = vsyncpa [#allocation4 + $0x1], 1 }

</bundles_post_ra>
